<compile_context>
chip_gen: v7x
topology: tpu7x:2x2x1
jax: 0.10.0
libtpu: 0.0.40
codegen_flags: <defaults>
</compile_context>

<pallas_src>
import functools

import numpy as np
import jax
import jax.numpy as jnp
from jax.experimental import pallas as pl
from jax.experimental.pallas import tpu as pltpu

LN_EPS = 1e-5


def _fused_mlp_kernel(gid_ref, x_ref, w1_ref, w2_ref, aux_ref, o_ref):
    """One row tile of: LayerNorm(SiLU(x @ W1 + b1) @ W2 + b2) for one group."""
    del gid_ref  # only consumed by the index_maps (weight-block selection)

    x = x_ref[...]                 # (row_tile, din_pad) f32
    w1 = w1_ref[0]                 # (din_pad, H)
    w2 = w2_ref[0]                 # (H, H)
    aux = aux_ref[0]               # (4, H): rows = b1, b2, gamma, beta
    b1 = aux[0:1, :]
    b2 = aux[1:2, :]
    gamma = aux[2:3, :]
    beta = aux[3:4, :]

    # Linear 1 + SiLU (MXU + VPU/EUP)
    h = jnp.dot(x, w1, preferred_element_type=jnp.float32) + b1
    h = h * jax.nn.sigmoid(h)

    # Linear 2 (MXU)
    y = jnp.dot(h, w2, preferred_element_type=jnp.float32) + b2

    # LayerNorm over the feature (lane) axis
    mean = jnp.mean(y, axis=-1, keepdims=True)
    yc = y - mean
    var = jnp.mean(yc * yc, axis=-1, keepdims=True)
    y = yc * jax.lax.rsqrt(var + LN_EPS) * gamma + beta

    o_ref[...] = y.astype(o_ref.dtype)


def _vmem_limit_bytes(row_tile, din_pad, h, itemsize):
    """Double-buffered x/out tiles + resident weight blocks, with headroom."""
    per_step = (row_tile * din_pad + row_tile * h      # x tile + out tile
                + din_pad * h + h * h + 4 * h)         # W1 + W2 + packed aux
    need = 2 * per_step * itemsize                     # double-buffering
    # 4x headroom for compiler scratch; cap below v7x's 64 MiB physical VMEM.
    return int(min(48 * 1024 * 1024, max(16 * 1024 * 1024, 4 * need)))


def graphcast_embedder(params, grid_features, mesh_features,
                       mesh2mesh_edge_features, grid2mesh_edge_features,
                       mesh2grid_edge_features, *, row_tile=512):
    """Forward pass mirroring GraphCastEmbedder.forward (same return order)."""
    # Group order == return order of the PyTorch module:
    # (grid, mesh, m2m, g2m, m2g)
    names = ("grid", "mesh", "m2m", "g2m", "m2g")
    xs = [grid_features, mesh_features, mesh2mesh_edge_features,
          grid2mesh_edge_features, mesh2grid_edge_features]
    plist = [params[n] for n in names]
    n_groups = len(xs)

    h = plist[0]["w1"].shape[1]
    assert all(p["w1"].shape[1] == h and p["w2"].shape == (h, h) for p in plist)
    assert row_tile % 8 == 0
    # TODO(synk): if hidden_dim is not a multiple of 128 the output store is a
    # masked vst; an in-kernel row-major repack to [rows*h//128, 128] would
    # make it lane-dense.  GraphCast hidden dims (128/256/512) are already OK.

    din_pad = max(8, -(-max(x.shape[1] for x in xs) // 8) * 8)
    itemsize = jnp.dtype(xs[0].dtype).itemsize

    # ---- pack rows: pad each group to a multiple of row_tile, then concat --
    tiles = [pl.cdiv(x.shape[0], row_tile) for x in xs]
    padded = [t * row_tile for t in tiles]
    offsets = np.concatenate([[0], np.cumsum(padded)]).astype(np.int64)
    x_all = jnp.concatenate(
        [jnp.pad(x, ((0, pr - x.shape[0]), (0, din_pad - x.shape[1])))
         for x, pr in zip(xs, padded)], axis=0)          # (total_rows, din_pad)

    # ---- pack weights along a leading group axis ---------------------------
    w1_all = jnp.stack(
        [jnp.pad(p["w1"], ((0, din_pad - p["w1"].shape[0]), (0, 0)))
         for p in plist])                                # (G, din_pad, H)
    w2_all = jnp.stack([p["w2"] for p in plist])         # (G, H, H)
    aux_all = jnp.stack(
        [jnp.stack([p["b1"], p["b2"], p["gamma"], p["beta"]])
         for p in plist])                                # (G, 4, H)

    # group id of each row tile, scalar-prefetched into SMEM for the index_maps
    group_ids = jnp.asarray(
        np.repeat(np.arange(n_groups, dtype=np.int32), tiles))

    num_tiles = int(np.sum(tiles))
    total_rows = int(offsets[-1])

    cost = pl.CostEstimate(
        flops=2 * total_rows * (din_pad * h + h * h) + 10 * total_rows * h,
        transcendentals=total_rows * h,
        bytes_accessed=itemsize * (total_rows * (din_pad + 2 * h)
                                   + n_groups * (din_pad * h + h * h + 4 * h)),
    )

    out_all = pl.pallas_call(
        _fused_mlp_kernel,
        out_shape=jax.ShapeDtypeStruct((total_rows, h), xs[0].dtype),
        grid_spec=pltpu.PrefetchScalarGridSpec(
            num_scalar_prefetch=1,
            grid=(num_tiles,),
            in_specs=[
                pl.BlockSpec((row_tile, din_pad), lambda i, gid: (i, 0)),
                pl.BlockSpec((1, din_pad, h), lambda i, gid: (gid[i], 0, 0)),
                pl.BlockSpec((1, h, h), lambda i, gid: (gid[i], 0, 0)),
                pl.BlockSpec((1, 4, h), lambda i, gid: (gid[i], 0, 0)),
            ],
            out_specs=pl.BlockSpec((row_tile, h), lambda i, gid: (i, 0)),
        ),
        compiler_params=pltpu.CompilerParams(
            dimension_semantics=("parallel",),
            vmem_limit_bytes=_vmem_limit_bytes(row_tile, din_pad, h, itemsize),
        ),
        cost_estimate=cost,
    )(group_ids, x_all, w1_all, w2_all, aux_all)

    # Slice padded rows off again; return order matches the PyTorch module:
    # (grid, mesh, m2m, g2m, m2g)
    return tuple(out_all[int(offsets[g]): int(offsets[g]) + xs[g].shape[0]]
                 for g in range(n_groups))


def init_mlp_params(key, input_dim, hidden_dim, dtype=jnp.float32):
    """Deterministic synthetic parameters (uniform fan-in style init)."""
    k1, k2, k3, k4 = jax.random.split(key, 4)
    s1 = 1.0 / jnp.sqrt(jnp.float32(input_dim))
    s2 = 1.0 / jnp.sqrt(jnp.float32(hidden_dim))
    return {
        "w1": jax.random.uniform(k1, (input_dim, hidden_dim), dtype, -s1, s1),
        "b1": jax.random.uniform(k2, (hidden_dim,), dtype, -s1, s1),
        "w2": jax.random.uniform(k3, (hidden_dim, hidden_dim), dtype, -s2, s2),
        "b2": jax.random.uniform(k4, (hidden_dim,), dtype, -s2, s2),
        "gamma": jnp.ones((hidden_dim,), dtype),
        "beta": jnp.zeros((hidden_dim,), dtype),
    }


def _ref_mlp(x, p):
    h = jnp.dot(x, p["w1"]) + p["b1"]
    h = h * jax.nn.sigmoid(h)
    y = jnp.dot(h, p["w2"]) + p["b2"]
    mean = jnp.mean(y, -1, keepdims=True)
    var = jnp.mean((y - mean) ** 2, -1, keepdims=True)
    return (y - mean) * jax.lax.rsqrt(var + LN_EPS) * p["gamma"] + p["beta"]


if __name__ == "__main__":
    # Small config consistent with GraphCast's embedder.  hidden_dim is a
    # multiple of 128 (real GraphCast uses 512) -> lane-dense output stores.
    grid_input_dim = 6
    mesh_input_dim = 3
    input_edge_dim = 4
    hidden_dim = 128

    n_grid = 300    # number of grid nodes   (deliberately not a tile multiple)
    n_mesh = 40     # number of mesh nodes
    n_m2m = 200     # mesh->mesh edges
    n_g2m = 100     # grid->mesh edges
    n_m2g = 96      # mesh->grid edges

    key = jax.random.PRNGKey(0)
    kp, kx = jax.random.split(key)
    kg, km, k1, k2, k3 = jax.random.split(kp, 5)
    params = {
        "grid": init_mlp_params(kg, grid_input_dim, hidden_dim),
        "mesh": init_mlp_params(km, mesh_input_dim, hidden_dim),
        "g2m": init_mlp_params(k1, input_edge_dim, hidden_dim),
        "m2g": init_mlp_params(k2, input_edge_dim, hidden_dim),
        "m2m": init_mlp_params(k3, input_edge_dim, hidden_dim),
    }

    kx1, kx2, kx3, kx4, kx5 = jax.random.split(kx, 5)
    grid_features = jax.random.normal(kx1, (n_grid, grid_input_dim), jnp.float32)
    mesh_features = jax.random.normal(kx2, (n_mesh, mesh_input_dim), jnp.float32)
    m2m_edges = jax.random.normal(kx3, (n_m2m, input_edge_dim), jnp.float32)
    g2m_edges = jax.random.normal(kx4, (n_g2m, input_edge_dim), jnp.float32)
    m2g_edges = jax.random.normal(kx5, (n_m2g, input_edge_dim), jnp.float32)

    fwd = jax.jit(functools.partial(graphcast_embedder, params))
    outs = fwd(grid_features, mesh_features, m2m_edges, g2m_edges, m2g_edges)
    outs = jax.block_until_ready(outs)

    # Pure-JAX reference check (same return order as the PyTorch module)
    refs = (
        _ref_mlp(grid_features, params["grid"]),
        _ref_mlp(mesh_features, params["mesh"]),
        _ref_mlp(m2m_edges, params["m2m"]),
        _ref_mlp(g2m_edges, params["g2m"]),
        _ref_mlp(m2g_edges, params["m2g"]),
    )
    for o, r in zip(outs, refs):
        assert o.shape == r.shape and o.dtype == r.dtype
        assert jnp.allclose(o, r, atol=5e-4, rtol=5e-4), \
            float(jnp.max(jnp.abs(o - r)))

    print("KERNEL_OK")
</pallas_src>

<mosaic_0001>
module attributes {stable_mosaic.version = 11 : i64} {
  func.func @_fused_mlp_kernel(%arg0: i32, %arg1: memref<5xi32, #tpu.memory_space<smem>>, %arg2: memref<512x8xf32, #tpu.memory_space<vmem>>, %arg3: memref<1x8x128xf32, #tpu.memory_space<vmem>>, %arg4: memref<1x128x128xf32, #tpu.memory_space<vmem>>, %arg5: memref<1x4x128xf32, #tpu.memory_space<vmem>>, %arg6: memref<512x128xf32, #tpu.memory_space<vmem>>) attributes {dimension_semantics = [#tpu.dimension_semantics<parallel>], iteration_bounds = array<i64: 5>, scalar_prefetch = 1 : i64, scratch_operands = 0 : i64, tpu.core_type = #tpu.core_type<tc>, window_params = [{transform_indices = @transform_0, window_bounds = array<i64: 512, 8>}, {transform_indices = @transform_1, window_bounds = array<i64: 1, 8, 128>}, {transform_indices = @transform_2, window_bounds = array<i64: 1, 128, 128>}, {transform_indices = @transform_3, window_bounds = array<i64: 1, 4, 128>}, {transform_indices = @transform_4, window_bounds = array<i64: 512, 128>}]} {
    %c0 = arith.constant 0 : index
    %c0_0 = arith.constant 0 : index
    %0 = vector.load %arg2[%c0, %c0_0] : memref<512x8xf32, #tpu.memory_space<vmem>>, vector<512x8xf32>
    %c0_1 = arith.constant 0 : index
    %c0_2 = arith.constant 0 : index
    %c0_3 = arith.constant 0 : index
    %1 = vector.load %arg3[%c0_1, %c0_2, %c0_3] : memref<1x8x128xf32, #tpu.memory_space<vmem>>, vector<1x8x128xf32>
    %2 = vector.shape_cast %1 : vector<1x8x128xf32> to vector<8x128xf32>
    %c0_4 = arith.constant 0 : index
    %c0_5 = arith.constant 0 : index
    %c0_6 = arith.constant 0 : index
    %3 = vector.load %arg4[%c0_4, %c0_5, %c0_6] : memref<1x128x128xf32, #tpu.memory_space<vmem>>, vector<1x128x128xf32>
    %4 = vector.shape_cast %3 : vector<1x128x128xf32> to vector<128x128xf32>
    %c0_7 = arith.constant 0 : index
    %c0_8 = arith.constant 0 : index
    %c0_9 = arith.constant 0 : index
    %5 = vector.load %arg5[%c0_7, %c0_8, %c0_9] : memref<1x4x128xf32, #tpu.memory_space<vmem>>, vector<1x4x128xf32>
    %6 = vector.shape_cast %5 : vector<1x4x128xf32> to vector<4x128xf32>
    %7 = vector.extract_strided_slice %6 {offsets = [0, 0], sizes = [1, 128], strides = [1, 1]} : vector<4x128xf32> to vector<1x128xf32>
    %8 = vector.extract_strided_slice %6 {offsets = [1, 0], sizes = [1, 128], strides = [1, 1]} : vector<4x128xf32> to vector<1x128xf32>
    %9 = vector.extract_strided_slice %6 {offsets = [2, 0], sizes = [1, 128], strides = [1, 1]} : vector<4x128xf32> to vector<1x128xf32>
    %10 = vector.extract_strided_slice %6 {offsets = [3, 0], sizes = [1, 128], strides = [1, 1]} : vector<4x128xf32> to vector<1x128xf32>
    %cst = arith.constant dense<0.000000e+00> : vector<512x128xf32>
    %11 = tpu.matmul %0, %2, %cst {dimension_numbers = #tpu.dot_dimension_numbers<[1], [0], [0], [1], [0, 0, 1, 1], [], []>} : vector<512x8xf32>, vector<8x128xf32>, vector<512x128xf32> -> vector<512x128xf32>
    %12 = vector.broadcast %7 : vector<1x128xf32> to vector<512x128xf32>
    %13 = arith.addf %11, %12 : vector<512x128xf32>
    %14 = arith.negf %13 : vector<512x128xf32>
    %15 = math.exp %14 : vector<512x128xf32>
    %cst_10 = arith.constant 1.000000e+00 : f32
    %16 = vector.broadcast %cst_10 : f32 to vector<512x128xf32>
    %17 = arith.addf %16, %15 : vector<512x128xf32>
    %18 = arith.divf %16, %17 : vector<512x128xf32>
    %19 = arith.mulf %13, %18 : vector<512x128xf32>
    %cst_11 = arith.constant dense<0.000000e+00> : vector<512x128xf32>
    %20 = tpu.matmul %19, %4, %cst_11 {dimension_numbers = #tpu.dot_dimension_numbers<[1], [0], [0], [1], [0, 0, 1, 1], [], []>} : vector<512x128xf32>, vector<128x128xf32>, vector<512x128xf32> -> vector<512x128xf32>
    %21 = vector.broadcast %8 : vector<1x128xf32> to vector<512x128xf32>
    %22 = arith.addf %20, %21 : vector<512x128xf32>
    %cst_12 = arith.constant dense<0.000000e+00> : vector<512xf32>
    %23 = vector.multi_reduction <add>, %22, %cst_12 [1] : vector<512x128xf32> to vector<512xf32>
    %24 = vector.shape_cast %23 : vector<512xf32> to vector<512x1xf32>
    %cst_13 = arith.constant 1.280000e+02 : f32
    %25 = vector.broadcast %cst_13 : f32 to vector<512x1xf32>
    %26 = arith.divf %24, %25 : vector<512x1xf32>
    %27 = vector.broadcast %26 : vector<512x1xf32> to vector<512x128xf32>
    %28 = arith.subf %22, %27 : vector<512x128xf32>
    %29 = arith.mulf %28, %28 : vector<512x128xf32>
    %cst_14 = arith.constant dense<0.000000e+00> : vector<512xf32>
    %30 = vector.multi_reduction <add>, %29, %cst_14 [1] : vector<512x128xf32> to vector<512xf32>
    %31 = vector.shape_cast %30 : vector<512xf32> to vector<512x1xf32>
    %cst_15 = arith.constant 1.280000e+02 : f32
    %32 = vector.broadcast %cst_15 : f32 to vector<512x1xf32>
    %33 = arith.divf %31, %32 : vector<512x1xf32>
    %cst_16 = arith.constant 9.99999974E-6 : f32
    %34 = vector.broadcast %cst_16 : f32 to vector<512x1xf32>
    %35 = arith.addf %33, %34 : vector<512x1xf32>
    %36 = math.rsqrt %35 : vector<512x1xf32>
    %37 = vector.broadcast %36 : vector<512x1xf32> to vector<512x128xf32>
    %38 = arith.mulf %28, %37 : vector<512x128xf32>
    %39 = vector.broadcast %9 : vector<1x128xf32> to vector<512x128xf32>
    %40 = arith.mulf %38, %39 : vector<512x128xf32>
    %41 = vector.broadcast %10 : vector<1x128xf32> to vector<512x128xf32>
    %42 = arith.addf %40, %41 : vector<512x128xf32>
    %c0_17 = arith.constant 0 : index
    %c0_18 = arith.constant 0 : index
    %43 = vector.load %arg6[%c0_17, %c0_18] : memref<512x128xf32, #tpu.memory_space<vmem>>, vector<512x128xf32>
    tpu.vector_store %arg6[%c0_17, %c0_18], %42 {strides = array<i32>} : memref<512x128xf32, #tpu.memory_space<vmem>>, vector<512x128xf32>,
    return
  }
  func.func @transform_0(%arg0: i32, %arg1: memref<5xi32, #tpu.memory_space<smem>>) -> (i32, i32) {
    %c0_i32 = arith.constant 0 : i32
    %c0_i32_0 = arith.constant 0 : i32
    return %arg0, %c0_i32 : i32, i32
  }
  func.func @transform_1(%arg0: i32, %arg1: memref<5xi32, #tpu.memory_space<smem>>) -> (i32, i32, i32) {
    %0 = arith.index_cast %arg0 : i32 to index
    %1 = memref.load %arg1[%0] : memref<5xi32, #tpu.memory_space<smem>>
    %c0_i32 = arith.constant 0 : i32
    %c0_i32_0 = arith.constant 0 : i32
    %c0_i32_1 = arith.constant 0 : i32
    return %1, %c0_i32, %c0_i32_0 : i32, i32, i32
  }
  func.func @transform_2(%arg0: i32, %arg1: memref<5xi32, #tpu.memory_space<smem>>) -> (i32, i32, i32) {
    %0 = arith.index_cast %arg0 : i32 to index
    %1 = memref.load %arg1[%0] : memref<5xi32, #tpu.memory_space<smem>>
    %c0_i32 = arith.constant 0 : i32
    %c0_i32_0 = arith.constant 0 : i32
    %c0_i32_1 = arith.constant 0 : i32
    return %1, %c0_i32, %c0_i32_0 : i32, i32, i32
  }
  func.func @transform_3(%arg0: i32, %arg1: memref<5xi32, #tpu.memory_space<smem>>) -> (i32, i32, i32) {
    %0 = arith.index_cast %arg0 : i32 to index
    %1 = memref.load %arg1[%0] : memref<5xi32, #tpu.memory_space<smem>>
    %c0_i32 = arith.constant 0 : i32
    %c0_i32_0 = arith.constant 0 : i32
    %c0_i32_1 = arith.constant 0 : i32
    return %1, %c0_i32, %c0_i32_0 : i32, i32, i32
  }
  func.func @transform_4(%arg0: i32, %arg1: memref<5xi32, #tpu.memory_space<smem>>) -> (i32, i32) {
    %c0_i32 = arith.constant 0 : i32
    %c0_i32_0 = arith.constant 0 : i32
    return %arg0, %c0_i32 : i32, i32
  }
}

</mosaic_0001>

<bundles_post_ra>
// kernel: graphcast_embedder.1
= control target key start
LH: loop header
LB: loop body
LE: loop exit
PB: predicated region body
PF: predicated region fallthrough
CT: control target
= control target key end

     0   :  { %s5155_s0 = inlined_call_operand.vmem [shape: s32[5], index: 0, kind: input, shape index: {}]   ;;  %s5156_s1 = inlined_call_operand.vmem [shape: f32[2560,8], index: 1, kind: input, shape index: {}]   ;;  %s5157_s2 = inlined_call_operand.vmem [shape: f32[5,8,128], index: 2, kind: input, shape index: {}]   ;;  %s5158_s3 = inlined_call_operand.vmem [shape: f32[5,128,128], index: 3, kind: input, shape index: {}]   ;;  %s5159_s4 = inlined_call_operand.vmem [shape: f32[5,4,128], index: 4, kind: input, shape index: {}]   ;;  %s5160_s5 = inlined_call_operand.vmem [shape: f32[2560,128], index: 5, kind: output, shape index: {}]  }
   0x1   :  { %s10_s20 = sshll.u32 %s5155_s0, 4  ;;  %s11_s20 = int_to_ptr.vmem [resolvable:$true] %s10_s20 }
   0x2   :  { %s3739_s21 = scalar_lea.vmem %s11_s20, 16  ;;  %p3744_p1 = scmp.lt.s32.totalorder %s11_s20, %s11_s20 }
   0x3   :  { %p3740_p0 = scmp.ne.s32.totalorder %s11_s20, %s3739_s21  ;;  %p3745_p2 = scmp.lt.s32.totalorder %s3739_s21, %s3739_s21 }
   0x5   :  { %p3746_p3 = por %p3745_p2, %p3744_p1 }
   0x7   :  { %p3747_p4 = pnand %p3746_p3, %p3740_p0 }
   0x9   :  { %3750 = shalt.err (!%p3747_p4)  }
   0xa   :  { %s3761_s22 = smov [#allocation3]  }
   0xb   :  { %13 = dma.vmem_to_smem %s11_s20, 16, %s3761_s22, [#allocation2] }
   0xc   :  { %3755 = dma.done.wait [#allocation2], 16 }
   0xd   :  { %3756 = vsyncadd [#allocation2], 4294967280 }
   0xe   :  { %15 = sfence }
   0xf   :  { %s3795_s23 = smov 0  }
  0x10 LB: > { %s3801_s0 = sadd.s32 4294967295, %s3759_s23   ;;  %p2785_p5 = scmp.ge.s32.totalorder %s3759_s23, 1  ;;  %s3759_s23 = sphi %s3795_s23, %s21_s23  }
  0x11   : > { %p210_p6 = scmp.lt.s32.totalorder %s3759_s23, 6 }
  0x13   : > { %p211_p7 = pnand %p2785_p5, %p210_p6 }
  0x15   : > { %214 = sbr.rel (%p211_p7) target bundleno = 941 (0x3ad), region = 36 }
  0x1c   : > { %s258_s24 = sld [smem:[#allocation3 + %s3801_s0]]  ;;  %s2786_s25 = sshll.u32 %s3801_s0, 6  ;;  %vm369_vm0 = vcmask 64512  }
  0x1d   : > { %p253_p8 = scmp.lt.s32.totalorder %s2786_s25, 319  ;;  %s264_s27 = sld [smem:[#allocation3 + %s3801_s0]] }
  0x1e   : > { %s271_s14 = sld [smem:[#allocation3 + %s3801_s0]] }
  0x1f   : > { %s5259_s25 = smov (!%p253_p8, %s2786_s25), 319 }
  0x20   : > { %s2787_s26 = sshll.u32 %s5259_s25, 3 }
  0x21   : > { %s3816_s30 = scalar_lea.vmem %s5156_s1, %s2787_s26  ;;  %s4896_s21 = scalar_lea.vmem %s5160_s5, %s2787_s26 }
  0x22   : > { %p259_p9 = scmp.lt.s32.totalorder %s258_s24, 4  ;;  %v283_v0 = vld [vmem:[%s3816_s30] sm:$0xff]  ;;  %v284_v2 = vld [vmem:[%s3816_s30 + $0x8] sm:$0xff]  ;;  %v285_v3 = vld [vmem:[%s3816_s30 + $0x10] sm:$0xff] }
  0x23   : > { %3072 = vmatprep.mubr.msk.f32.mxu0 %vm369_vm0, %v283_v0  ;;  %p265_p10 = scmp.lt.s32.totalorder %s264_s27, 4  ;;  %v286_v4 = vld [vmem:[%s3816_s30 + $0x18] sm:$0xff]  ;;  %v287_v5 = vld [vmem:[%s3816_s30 + $0x20] sm:$0xff]  ;;  %v288_v6 = vld [vmem:[%s3816_s30 + $0x28] sm:$0xff] }
  0x24   : > { %s5261_s24 = smov (!%p259_p9, %s258_s24), 4  ;;  %v289_v7 = vld [vmem:[%s3816_s30 + $0x30] sm:$0xff]  ;;  %v290_v8 = vld [vmem:[%s3816_s30 + $0x38] sm:$0xff]  ;;  %v291_v9 = vld [vmem:[%s3816_s30 + $0x40] sm:$0xff]  ;;  %p272_p11 = scmp.lt.s32.totalorder %s271_s14, 4 }
  0x25   : > { %s2788_s6 = sshll.u32 %s5261_s24, 3  ;;  %s5263_s27 = smov (!%p265_p10, %s264_s27), 4  ;;  %v292_v12 = vld [vmem:[%s3816_s30 + $0x48] sm:$0xff]  ;;  %v293_v14 = vld [vmem:[%s3816_s30 + $0x50] sm:$0xff]  ;;  %v294_v20 = vld [vmem:[%s3816_s30 + $0x58] sm:$0xff] }
  0x26   : > { %s262_s9 = scalar_lea.vmem %s5157_s2, %s2788_s6  ;;  %s2924_s10 = sshll.u32 %s5263_s27, 7  ;;  %v295_v21 = vld [vmem:[%s3816_s30 + $0x60] sm:$0xff]  ;;  %v296_v25 = vld [vmem:[%s3816_s30 + $0x68] sm:$0xff]  ;;  %v297_v26 = vld [vmem:[%s3816_s30 + $0x70] sm:$0xff] }
  0x27   : > { %v347_v1 = vld [vmem:[%s262_s9] sm:$0xff]  ;;  %s3839_s13 = scalar_lea.vmem %s5158_s3, %s2924_s10  ;;  %v298_v30 = vld [vmem:[%s3816_s30 + $0x78] sm:$0xff]  ;;  %v300_v35 = vld [vmem:[%s3816_s30 + $0x88] sm:$0xff]  ;;  %s5265_s14 = smov (!%p272_p11, %s271_s14), 4 }
  0x28   : > { %3070 = vmatprep.subr.mxu0 %v347_v1  ;;  %v348_v10 = vld [vmem:[%s3839_s13] sm:$0xff]  ;;  %v349_v11 = vld [vmem:[%s3839_s13 + $0x8] sm:$0xff]  ;;  %v350_v15 = vld [vmem:[%s3839_s13 + $0x10] sm:$0xff]  ;;  %s2791_s15 = sshll.u32 %s5265_s14, 2 }
  0x29   : > { %3071 = vmatpush3.msra.mxu0 %v347_v1  ;;  %v3296_v13 = vpack.c.bf16 %v349_v11, %v348_v10  ;;  %v351_v16 = vld [vmem:[%s3839_s13 + $0x18] sm:$0xff]  ;;  %v352_v18 = vld [vmem:[%s3839_s13 + $0x20] sm:$0xff]  ;;  %v353_v19 = vld [vmem:[%s3839_s13 + $0x28] sm:$0xff]  ;;  %s3976_s18 = scalar_lea.vmem %s5159_s4, %s2791_s15 }
  0x2a   : > { %3073 = vmatmul.mubr.msk.f32.vlgmr.msra.gmra.mrb[0].mxu0 %vm369_vm0, %v284_v2  ;;  %v3300_v17 = vpack.c.bf16 %v351_v16, %v350_v15  ;;  %v3304_v22 = vpack.c.bf16 %v353_v19, %v352_v18  ;;  %v354_v23 = vld [vmem:[%s3839_s13 + $0x30] sm:$0xff]  ;;  %v355_v24 = vld [vmem:[%s3839_s13 + $0x38] sm:$0xff]  ;;  %v356_v28 = vld [vmem:[%s3839_s13 + $0x40] sm:$0xff] }
  0x2b   : > { %3075 = vmatprep.mubr.msk.f32.mxu0 %vm369_vm0, %v285_v3  ;;  %3297 = vmatprep.subr.bf16.mxu0 %v3296_v13  ;;  %v3308_v27 = vpack.c.bf16 %v355_v24, %v354_v23  ;;  %v357_v29 = vld [vmem:[%s3839_s13 + $0x48] sm:$0xff]  ;;  %v299_v31 = vld [vmem:[%s3816_s30 + $0x80] sm:$0xff]  ;;  %v358_v33 = vld [vmem:[%s3839_s13 + $0x50] sm:$0xff] }
  0x2c   : > { %3328 = vmatprep.subr.bf16.mxu1 %v3296_v13  ;;  %3299 = vmatpush3.bf16.msra.mxu0 %v3296_v13  ;;  %v3312_v32 = vpack.c.bf16 %v357_v29, %v356_v28  ;;  %v359_v34 = vld [vmem:[%s3839_s13 + $0x58] sm:$0xff]  ;;  %v301_v36 = vld [vmem:[%s3816_s30 + $0x90] sm:$0xff]  ;;  %v303_v39 = vld [vmem:[%s3816_s30 + $0xa0] sm:$0xff] }
  0x2d   : > { %3336 = vmatpush3.bf16.msra.mxu1 %v3296_v13  ;;  %3301 = vmatprep.subr.bf16.mxu0 %v3300_v17  ;;  %v3316_v37 = vpack.c.bf16 %v359_v34, %v358_v33  ;;  %v302_v38 = vld [vmem:[%s3816_s30 + $0x98] sm:$0xff]  ;;  %v304_v40 = vld [vmem:[%s3816_s30 + $0xa8] sm:$0xff]  ;;  %v305_v41 = vld [vmem:[%s3816_s30 + $0xb0] sm:$0xff] }
  0x2e   : > { %3076 = vmatmul.mubr.msk.f32.gmra.mrb[2].mxu0 %vm369_vm0, %v286_v4  ;;  %3329 = vmatprep.subr.bf16.mxu1 %v3300_v17  ;;  %v306_v42 = vld [vmem:[%s3816_s30 + $0xb8] sm:$0xff]  ;;  %v307_v43 = vld [vmem:[%s3816_s30 + $0xc0] sm:$0xff]  ;;  %v308_v44 = vld [vmem:[%s3816_s30 + $0xc8] sm:$0xff] }
  0x2f   : > { %3078 = vmatprep.mubr.msk.f32.mxu0 %vm369_vm0, %v287_v5  ;;  %v309_v45 = vld [vmem:[%s3816_s30 + $0xd0] sm:$0xff]  ;;  %v310_v46 = vld [vmem:[%s3816_s30 + $0xd8] sm:$0xff]  ;;  %v311_v47 = vld [vmem:[%s3816_s30 + $0xe0] sm:$0xff] }
  0x30   : > { %3303 = vmatpush3.bf16.msra.mxu0 %v3300_v17  ;;  %v312_v48 = vld [vmem:[%s3816_s30 + $0xe8] sm:$0xff]  ;;  %v313_v49 = vld [vmem:[%s3816_s30 + $0xf0] sm:$0xff]  ;;  %v314_v50 = vld [vmem:[%s3816_s30 + $0xf8] sm:$0xff] }
  0x31   : > { %3337 = vmatpush3.bf16.msra.mxu1 %v3300_v17  ;;  %3305 = vmatprep.subr.bf16.mxu0 %v3304_v22  ;;  %v315_v51 = vld [vmem:[%s3816_s30 + $0x100] sm:$0xff]  ;;  %v316_v52 = vld [vmem:[%s3816_s30 + $0x108] sm:$0xff]  ;;  %v317_v53 = vld [vmem:[%s3816_s30 + $0x110] sm:$0xff] }
  0x32   : > { %3079 = vmatmul.mubr.msk.f32.gmra.mrb[4].mxu0 %vm369_vm0, %v288_v6  ;;  %3330 = vmatprep.subr.bf16.mxu1 %v3304_v22  ;;  %v318_v54 = vld [vmem:[%s3816_s30 + $0x118] sm:$0xff]  ;;  %v319_v55 = vld [vmem:[%s3816_s30 + $0x120] sm:$0xff]  ;;  %v320_v56 = vld [vmem:[%s3816_s30 + $0x128] sm:$0xff] }
  0x33   : > { %3081 = vmatprep.mubr.msk.f32.mxu0 %vm369_vm0, %v289_v7  ;;  %v321_v57 = vld [vmem:[%s3816_s30 + $0x130] sm:$0xff]  ;;  %v322_v58 = vld [vmem:[%s3816_s30 + $0x138] sm:$0xff]  ;;  %v323_v59 = vld [vmem:[%s3816_s30 + $0x140] sm:$0xff] }
  0x34   : > { %3307 = vmatpush3.bf16.msra.mxu0 %v3304_v22  ;;  %v324_v60 = vld [vmem:[%s3816_s30 + $0x148] sm:$0xff]  ;;  %v325_v61 = vld [vmem:[%s3816_s30 + $0x150] sm:$0xff]  ;;  %v326_v62 = vld [vmem:[%s3816_s30 + $0x158] sm:$0xff] }
  0x35   : > { %3338 = vmatpush3.bf16.msra.mxu1 %v3304_v22  ;;  %3309 = vmatprep.subr.bf16.mxu0 %v3308_v27  ;;  %v327_v63 = vld [vmem:[%s3816_s30 + $0x160] sm:$0xff]  ;;  %v328_v0 = vld [vmem:[%s3816_s30 + $0x168] sm:$0xff]  ;;  %v329_v1 = vld [vmem:[%s3816_s30 + $0x170] sm:$0xff] }
  0x36   : > { %3082 = vmatmul.mubr.msk.f32.gmra.mrb[6].mxu0 %vm369_vm0, %v290_v8  ;;  %3331 = vmatprep.subr.bf16.mxu1 %v3308_v27  ;;  %v330_v2 = vld [vmem:[%s3816_s30 + $0x178] sm:$0xff]  ;;  %v331_v3 = vld [vmem:[%s3816_s30 + $0x180] sm:$0xff]  ;;  %v332_v4 = vld [vmem:[%s3816_s30 + $0x188] sm:$0xff] }
  0x37   : > { %3084 = vmatprep.mubr.msk.f32.mxu0 %vm369_vm0, %v291_v9  ;;  %v333_v5 = vld [vmem:[%s3816_s30 + $0x190] sm:$0xff]  ;;  %v334_v6 = vld [vmem:[%s3816_s30 + $0x198] sm:$0xff]  ;;  %v335_v7 = vld [vmem:[%s3816_s30 + $0x1a0] sm:$0xff] }
  0x38   : > { %3311 = vmatpush3.bf16.msra.mxu0 %v3308_v27  ;;  %v336_v8 = vld [vmem:[%s3816_s30 + $0x1a8] sm:$0xff]  ;;  %v337_v9 = vld [vmem:[%s3816_s30 + $0x1b0] sm:$0xff]  ;;  %v338_v10 = vld [vmem:[%s3816_s30 + $0x1b8] sm:$0xff] }
  0x39   : > { %3339 = vmatpush3.bf16.msra.mxu1 %v3308_v27  ;;  %3313 = vmatprep.subr.bf16.mxu0 %v3312_v32  ;;  %v360_v11 = vld [vmem:[%s3839_s13 + $0x60] sm:$0xff]  ;;  %v340_v15 = vld [vmem:[%s3816_s30 + $0x1c8] sm:$0xff]  ;;  %v341_v16 = vld [vmem:[%s3816_s30 + $0x1d0] sm:$0xff] }
  0x3a   : > { %3085 = vmatmul.mubr.msk.f32.gmra.mrb[8].mxu0 %vm369_vm0, %v292_v12  ;;  %3332 = vmatprep.subr.bf16.mxu1 %v3312_v32  ;;  %v361_v12 = vld [vmem:[%s3839_s13 + $0x68] sm:$0xff]  ;;  %v339_v13 = vld [vmem:[%s3816_s30 + $0x1c0] sm:$0xff]  ;;  %v362_v17 = vld [vmem:[%s3839_s13 + $0x70] sm:$0xff] }
  0x3b   : > { %3087 = vmatprep.mubr.msk.f32.mxu0 %vm369_vm0, %v293_v14  ;;  %v3320_v14 = vpack.c.bf16 %v361_v12, %v360_v11  ;;  %v363_v18 = vld [vmem:[%s3839_s13 + $0x78] sm:$0xff]  ;;  %v344_v22 = vld [vmem:[%s3816_s30 + $0x1e8] sm:$0xff]  ;;  %v345_v23 = vld [vmem:[%s3816_s30 + $0x1f0] sm:$0xff] }
  0x3c   : > { %3315 = vmatpush3.bf16.msra.mxu0 %v3312_v32  ;;  %v3324_v19 = vpack.c.bf16 %v363_v18, %v362_v17  ;;  %v346_v24 = vld [vmem:[%s3816_s30 + $0x1f8] sm:$0xff]  ;;  %v364_v28 = vld [vmem:[%s3976_s18] sm:$0xf] }
  0x3d   : > { %3340 = vmatpush3.bf16.msra.mxu1 %v3312_v32  ;;  %3317 = vmatprep.subr.bf16.mxu0 %v3316_v37 }
  0x3e   : > { %3088 = vmatmul.mubr.msk.f32.gmra.mrb[10].mxu0 %vm369_vm0, %v294_v20  ;;  %3333 = vmatprep.subr.bf16.mxu1 %v3316_v37  ;;  %v342_v20 = vld [vmem:[%s3816_s30 + $0x1d8] sm:$0xff] }
  0x3f   : > { %3090 = vmatprep.mubr.msk.f32.mxu0 %vm369_vm0, %v295_v21  ;;  %v343_v21 = vld [vmem:[%s3816_s30 + $0x1e0] sm:$0xff] }
  0x40   : > { %3319 = vmatpush3.bf16.msra.mxu0 %v3316_v37 }
  0x41   : > { %3341 = vmatpush3.bf16.msra.mxu1 %v3316_v37  ;;  %3321 = vmatprep.subr.bf16.mxu0 %v3320_v14 }
  0x42   : > { %3091 = vmatmul.mubr.msk.f32.gmra.mrb[12].mxu0 %vm369_vm0, %v296_v25  ;;  %3334 = vmatprep.subr.bf16.mxu1 %v3320_v14  ;;  %v365_v25 = vlaneseq }
  0x43   : > { %3093 = vmatprep.mubr.msk.f32.mxu0 %vm369_vm0, %v297_v26 }
  0x44   : > { %3323 = vmatpush3.bf16.msra.mxu0 %v3320_v14  ;;  %v3971_v26 = vshrl.u32 %v365_v25, 7 }
  0x45   : > { %3342 = vmatpush3.bf16.msra.mxu1 %v3320_v14  ;;  %3325 = vmatprep.subr.bf16.mxu0 %v3324_v19 }
  0x46   : > { %3094 = vmatmul.mubr.msk.f32.gmra.mrb[14].mxu0 %vm369_vm0, %v298_v30  ;;  %3335 = vmatprep.subr.bf16.mxu1 %v3324_v19  ;;  %5194 = vst [vmem:[#allocation5_spill] sm:$0xff] %v3971_v26  ;;  %v367_v27 = vsub.s32 0, %v3971_v26 }
  0x47   : > { %3096 = vmatprep.mubr.msk.f32.mxu0 %vm369_vm0, %v299_v31 }
  0x48   : > { %3327 = vmatpush3.bf16.msra.mxu0 %v3324_v19  ;;  %v3980_v29 = vrot.slane %v364_v28, %v367_v27 }
  0x49   : > { %3343 = vmatpush3.bf16.msra.mxu1 %v3324_v19 }
  0x4a   : > { %3097 = vmatmul.mubr.msk.f32.gmra.mrb[16].mxu0 %vm369_vm0, %v300_v35 }
  0x4b   : > { %3099 = vmatprep.mubr.msk.f32.mxu0 %vm369_vm0, %v301_v36 }
  0x4e   : > { %3100 = vmatmul.mubr.msk.f32.gmra.mrb[18].mxu0 %vm369_vm0, %v302_v38 }
  0x4f   : > { %3102 = vmatprep.mubr.msk.f32.mxu0 %vm369_vm0, %v303_v39 }
  0x52   : > { %3103 = vmatmul.mubr.msk.f32.gmra.mrb[20].mxu0 %vm369_vm0, %v304_v40 }
  0x53   : > { %3105 = vmatprep.mubr.msk.f32.mxu0 %vm369_vm0, %v305_v41 }
  0x56   : > { %3106 = vmatmul.mubr.msk.f32.gmra.mrb[22].mxu0 %vm369_vm0, %v306_v42 }
  0x57   : > { %3108 = vmatprep.mubr.msk.f32.mxu0 %vm369_vm0, %v307_v43 }
  0x5a   : > { %3109 = vmatmul.mubr.msk.f32.gmra.mrb[24].mxu0 %vm369_vm0, %v308_v44 }
  0x5b   : > { %3111 = vmatprep.mubr.msk.f32.mxu0 %vm369_vm0, %v309_v45 }
  0x5e   : > { %3112 = vmatmul.mubr.msk.f32.gmra.mrb[26].mxu0 %vm369_vm0, %v310_v46 }
  0x5f   : > { %3114 = vmatprep.mubr.msk.f32.mxu0 %vm369_vm0, %v311_v47 }
  0x62   : > { %3115 = vmatmul.mubr.msk.f32.gmra.mrb[28].mxu0 %vm369_vm0, %v312_v48 }
  0x63   : > { %3117 = vmatprep.mubr.msk.f32.mxu0 %vm369_vm0, %v313_v49 }
  0x66   : > { %3118 = vmatmul.mubr.msk.f32.gmra.mrb[30].mxu0 %vm369_vm0, %v314_v50 }
  0x67   : > { %3120 = vmatprep.mubr.msk.f32.mxu0 %vm369_vm0, %v315_v51 }
  0x6a   : > { %3121 = vmatmul.mubr.msk.f32.gmra.mrb[32].mxu0 %vm369_vm0, %v316_v52 }
  0x6b   : > { %3123 = vmatprep.mubr.msk.f32.mxu0 %vm369_vm0, %v317_v53 }
  0x6e   : > { %3124 = vmatmul.mubr.msk.f32.gmra.mrb[34].mxu0 %vm369_vm0, %v318_v54 }
  0x6f   : > { %3126 = vmatprep.mubr.msk.f32.mxu0 %vm369_vm0, %v319_v55 }
  0x72   : > { %3127 = vmatmul.mubr.msk.f32.gmra.mrb[36].mxu0 %vm369_vm0, %v320_v56 }
  0x73   : > { %3129 = vmatprep.mubr.msk.f32.mxu0 %vm369_vm0, %v321_v57 }
  0x76   : > { %3130 = vmatmul.mubr.msk.f32.gmra.mrb[38].mxu0 %vm369_vm0, %v322_v58 }
  0x77   : > { %3132 = vmatprep.mubr.msk.f32.mxu0 %vm369_vm0, %v323_v59 }
  0x7a   : > { %3133 = vmatmul.mubr.msk.f32.gmra.mrb[40].mxu0 %vm369_vm0, %v324_v60 }
  0x7b   : > { %3135 = vmatprep.mubr.msk.f32.mxu0 %vm369_vm0, %v325_v61 }
  0x7e   : > { %3136 = vmatmul.mubr.msk.f32.gmra.mrb[42].mxu0 %vm369_vm0, %v326_v62 }
  0x7f   : > { %3138 = vmatprep.mubr.msk.f32.mxu0 %vm369_vm0, %v327_v63 }
  0x82   : > { %3139 = vmatmul.mubr.msk.f32.gmra.mrb[44].mxu0 %vm369_vm0, %v328_v0 }
  0x83   : > { %3141 = vmatprep.mubr.msk.f32.mxu0 %vm369_vm0, %v329_v1 }
  0x86   : > { %3142 = vmatmul.mubr.msk.f32.gmra.mrb[46].mxu0 %vm369_vm0, %v330_v2 }
  0x87   : > { %3144 = vmatprep.mubr.msk.f32.mxu0 %vm369_vm0, %v331_v3 }
  0x8a   : > { %3145 = vmatmul.mubr.msk.f32.gmra.mrb[48].mxu0 %vm369_vm0, %v332_v4 }
  0x8b   : > { %3147 = vmatprep.mubr.msk.f32.mxu0 %vm369_vm0, %v333_v5 }
  0x8e   : > { %3148 = vmatmul.mubr.msk.f32.gmra.mrb[50].mxu0 %vm369_vm0, %v334_v6 }
  0x8f   : > { %3150 = vmatprep.mubr.msk.f32.mxu0 %vm369_vm0, %v335_v7 }
  0x92   : > { %3151 = vmatmul.mubr.msk.f32.gmra.mrb[52].mxu0 %vm369_vm0, %v336_v8 }
  0x93   : > { %3153 = vmatprep.mubr.msk.f32.mxu0 %vm369_vm0, %v337_v9 }
  0x96   : > { %3154 = vmatmul.mubr.msk.f32.gmra.mrb[54].mxu0 %vm369_vm0, %v338_v10 }
  0x97   : > { %3156 = vmatprep.mubr.msk.f32.mxu0 %vm369_vm0, %v339_v13 }
  0x9a   : > { %3157 = vmatmul.mubr.msk.f32.gmra.mrb[56].mxu0 %vm369_vm0, %v340_v15 }
  0x9b   : > { %3159 = vmatprep.mubr.msk.f32.mxu0 %vm369_vm0, %v341_v16 }
  0x9e   : > { %3160 = vmatmul.mubr.msk.f32.gmra.mrb[58].mxu0 %vm369_vm0, %v342_v20 }
  0x9f   : > { %3162 = vmatprep.mubr.msk.f32.mxu0 %vm369_vm0, %v343_v21 }
  0xa2   : > { %3163 = vmatmul.mubr.msk.f32.gmra.mrb[60].mxu0 %vm369_vm0, %v344_v22 }
  0xa3   : > { %3165 = vmatprep.mubr.msk.f32.mxu0 %vm369_vm0, %v345_v23 }
  0xa6   : > { %3166 = vmatmul.mubr.msk.f32.gmra.mrb[62].mxu0 %vm369_vm0, %v346_v24 }
  0xfd   : > { %v3074_v30 = vpop.f32.mrb[0].mxu0 }
  0xfe   : > { %v3983_v31 = vadd.f32 %v3074_v30, %v3980_v29  ;;  %v628_v32 = vpop.f32.mrb[1].mxu0 }
  0xff   : > { %v3986_v33 = vadd.f32 %v628_v32, %v3980_v29 }
 0x100   : > { %v2859_v34 = vmul.f32 -1.442695, %v3983_v31 }
 0x101   : > { %v2858_v35 = vmul.f32 -1.442695, %v3986_v33  ;;  %v3077_v36 = vpop.f32.mrb[2].mxu0 }
 0x102   : > { %3353 = vpow2.f32 %v2859_v34  ;;  %v3991_v37 = vadd.f32 %v3077_v36, %v3980_v29  ;;  %v638_v38 = vpop.f32.mrb[3].mxu0 }
 0x103   : > { %3355 = vpow2.f32 %v2858_v35  ;;  %v3994_v39 = vadd.f32 %v638_v38, %v3980_v29 }
 0x104   : > { %v2861_v40 = vmul.f32 -1.442695, %v3991_v37 }
 0x105   : > { %v2860_v41 = vmul.f32 -1.442695, %v3994_v39  ;;  %v3080_v42 = vpop.f32.mrb[4].mxu0 }
 0x106   : > { %3357 = vpow2.f32 %v2861_v40  ;;  %v3999_v43 = vadd.f32 %v3080_v42, %v3980_v29  ;;  %v648_v44 = vpop.f32.mrb[5].mxu0 }
 0x107   : > { %3359 = vpow2.f32 %v2860_v41  ;;  %v4002_v45 = vadd.f32 %v648_v44, %v3980_v29 }
 0x108   : > { %v2863_v46 = vmul.f32 -1.442695, %v3999_v43 }
 0x109   : > { %v2862_v47 = vmul.f32 -1.442695, %v4002_v45  ;;  %v3083_v48 = vpop.f32.mrb[6].mxu0 }
 0x10a   : > { %3361 = vpow2.f32 %v2863_v46  ;;  %v4007_v49 = vadd.f32 %v3083_v48, %v3980_v29  ;;  %v658_v50 = vpop.f32.mrb[7].mxu0 }
 0x10b   : > { %3363 = vpow2.f32 %v2862_v47  ;;  %v4010_v51 = vadd.f32 %v658_v50, %v3980_v29 }
 0x10c   : > { %v3354_v52 = vpop.eup %3353  ;;  %v2865_v53 = vmul.f32 -1.442695, %v4007_v49 }
 0x10d   : > { %v3356_v54 = vpop.eup %3355  ;;  %v1140_v55 = vadd.f32 1.0, %v3354_v52  ;;  %v2864_v56 = vmul.f32 -1.442695, %v4010_v51  ;;  %v3086_v57 = vpop.f32.mrb[8].mxu0 }
 0x10e   : > { %v1139_v58 = vadd.f32 1.0, %v3356_v54  ;;  %3365 = vpow2.f32 %v2865_v53  ;;  %v4015_v59 = vadd.f32 %v3086_v57, %v3980_v29  ;;  %v668_v60 = vpop.f32.mrb[9].mxu0 }
 0x10f   : > { %3367 = vrcp.f32 %v1140_v55  ;;  %v4018_v61 = vadd.f32 %v668_v60, %v3980_v29 }
 0x110   : > { %v3358_v62 = vpop.eup %3357  ;;  %3369 = vrcp.f32 %v1139_v58  ;;  %v2867_v63 = vmul.f32 -1.442695, %v4015_v59 }
 0x111   : > { %v3360_v0 = vpop.eup %3359  ;;  %v1142_v1 = vadd.f32 1.0, %v3358_v62  ;;  %3371 = vpow2.f32 %v2864_v56  ;;  %v2866_v2 = vmul.f32 -1.442695, %v4018_v61  ;;  %v3089_v3 = vpop.f32.mrb[10].mxu0 }
 0x112   : > { %v1141_v4 = vadd.f32 1.0, %v3360_v0  ;;  %3373 = vpow2.f32 %v2867_v63  ;;  %v4023_v5 = vadd.f32 %v3089_v3, %v3980_v29  ;;  %v678_v6 = vpop.f32.mrb[11].mxu0 }
 0x113   : > { %3375 = vrcp.f32 %v1142_v1  ;;  %v4026_v7 = vadd.f32 %v678_v6, %v3980_v29 }
 0x114   : > { %v3362_v8 = vpop.eup %3361  ;;  %3377 = vrcp.f32 %v1141_v4  ;;  %v2869_v9 = vmul.f32 -1.442695, %v4023_v5 }
 0x115   : > { %v3364_v10 = vpop.eup %3363  ;;  %v1144_v11 = vadd.f32 1.0, %v3362_v8  ;;  %3379 = vpow2.f32 %v2866_v2  ;;  %v2868_v12 = vmul.f32 -1.442695, %v4026_v7  ;;  %v3092_v13 = vpop.f32.mrb[12].mxu0 }
 0x116   : > { %v1143_v14 = vadd.f32 1.0, %v3364_v10  ;;  %3381 = vpow2.f32 %v2869_v9  ;;  %v4031_v15 = vadd.f32 %v3092_v13, %v3980_v29  ;;  %v688_v16 = vpop.f32.mrb[13].mxu0 }
 0x117   : > { %3383 = vrcp.f32 %v1144_v11  ;;  %v4034_v17 = vadd.f32 %v688_v16, %v3980_v29 }
 0x118   : > { %v3366_v18 = vpop.eup %3365  ;;  %3385 = vrcp.f32 %v1143_v14  ;;  %v2871_v19 = vmul.f32 -1.442695, %v4031_v15 }
 0x119   : > { %v3368_v20 = vpop.eup %3367  ;;  %v1146_v21 = vadd.f32 1.0, %v3366_v18  ;;  %3387 = vpow2.f32 %v2868_v12  ;;  %v2870_v22 = vmul.f32 -1.442695, %v4034_v17  ;;  %v3095_v23 = vpop.f32.mrb[14].mxu0 }
 0x11a   : > { %v3370_v24 = vpop.eup %3369  ;;  %3389 = vpow2.f32 %v2871_v19  ;;  %v4039_v25 = vadd.f32 %v3095_v23, %v3980_v29  ;;  %v698_v27 = vpop.f32.mrb[15].mxu0  ;;  %v1332_v35 = vmul.f32 %v3368_v20, %v3983_v31 }
 0x11b   : > { %v3372_v28 = vpop.eup %3371  ;;  %v1331_v30 = vmul.f32 %v3370_v24, %v3986_v33  ;;  %v4043_v32 = vadd.f32 %v698_v27, %v3980_v29  ;;  %3391 = vpow2.f32 %v2870_v22 }
 0x11c   : > { %v3374_v34 = vpop.eup %3373  ;;  %v1145_v36 = vadd.f32 1.0, %v3372_v28  ;;  %v2873_v38 = vmul.f32 -1.442695, %v4039_v25  ;;  %3393 = vrcp.f32 %v1146_v21 }
 0x11d   : > { %v3376_v40 = vpop.eup %3375  ;;  %v1148_v41 = vadd.f32 1.0, %v3374_v34  ;;  %v2872_v42 = vmul.f32 -1.442695, %v4043_v32  ;;  %v3098_v44 = vpop.f32.mrb[16].mxu0  ;;  %3200 = vmatprep.mubr.f32.mxu0 %v1331_v30 }
 0x11e   : > { %v3378_v46 = vpop.eup %3377  ;;  %3395 = vrcp.f32 %v1145_v36  ;;  %v4049_v33 = vadd.f32 %v3098_v44, %v3980_v29  ;;  %v708_v47 = vpop.f32.mrb[17].mxu0  ;;  %3201 = vmatmul.mubr.f32.vlgmr.msra.gmra.mrb[64].mxu0 %v1332_v35  ;;  %v1334_v53 = vmul.f32 %v3376_v40, %v3991_v37 }
 0x11f   : > { %v3380_v48 = vpop.eup %3379  ;;  %v1333_v31 = vmul.f32 %v3378_v46, %v3994_v39  ;;  %3397 = vrcp.f32 %v1148_v41  ;;  %v4053_v50 = vadd.f32 %v708_v47, %v3980_v29 }
 0x120   : > { %v3382_v52 = vpop.eup %3381  ;;  %v1147_v54 = vadd.f32 1.0, %v3380_v48  ;;  %3399 = vpow2.f32 %v2873_v38  ;;  %v2875_v55 = vmul.f32 -1.442695, %v4049_v33 }
 0x121   : > { %v3384_v56 = vpop.eup %3383  ;;  %v1150_v57 = vadd.f32 1.0, %v3382_v52  ;;  %3401 = vpow2.f32 %v2872_v42  ;;  %v2874_v58 = vmul.f32 -1.442695, %v4053_v50  ;;  %v3101_v60 = vpop.f32.mrb[18].mxu0  ;;  %3203 = vmatprep.mubr.f32.mxu0 %v1333_v31 }
 0x122   : > { %v3386_v62 = vpop.eup %3385  ;;  %3403 = vrcp.f32 %v1147_v54  ;;  %v4059_v39 = vadd.f32 %v3101_v60, %v3980_v29  ;;  %v718_v63 = vpop.f32.mrb[19].mxu0  ;;  %3204 = vmatmul.mubr.f32.gmra.mrb[66].mxu0 %v1334_v53  ;;  %v1336_v3 = vmul.f32 %v3384_v56, %v3999_v43 }
 0x123   : > { %v3388_v0 = vpop.eup %3387  ;;  %v1335_v37 = vmul.f32 %v3386_v62, %v4002_v45  ;;  %3405 = vrcp.f32 %v1150_v57  ;;  %v4063_v1 = vadd.f32 %v718_v63, %v3980_v29 }
 0x124   : > { %v3390_v2 = vpop.eup %3389  ;;  %v1149_v4 = vadd.f32 1.0, %v3388_v0  ;;  %3407 = vpow2.f32 %v2875_v55  ;;  %v2877_v6 = vmul.f32 -1.442695, %v4059_v39 }
 0x125   : > { %v1152_v8 = vadd.f32 1.0, %v3390_v2  ;;  %3409 = vpow2.f32 %v2874_v58  ;;  %v3104_v9 = vpop.f32.mrb[20].mxu0  ;;  %3206 = vmatprep.mubr.f32.mxu0 %v1335_v37  ;;  %v3392_v10 = vpop.eup %3391  ;;  %v2876_v11 = vmul.f32 -1.442695, %v4063_v1 }
 0x126   : > { %3411 = vrcp.f32 %v1149_v4  ;;  %v4069_v45 = vadd.f32 %v3104_v9, %v3980_v29  ;;  %v728_v12 = vpop.f32.mrb[21].mxu0  ;;  %3207 = vmatmul.mubr.f32.gmra.mrb[68].mxu0 %v1336_v3  ;;  %v3394_v13 = vpop.eup %3393  ;;  %v1151_v43 = vadd.f32 1.0, %v3392_v10 }
 0x127   : > { %3413 = vrcp.f32 %v1152_v8  ;;  %v4072_v14 = vadd.f32 %v728_v12, %v3980_v29  ;;  %v1338_v24 = vmul.f32 %v3394_v13, %v4007_v49 }
 0x128   : > { %v3396_v16 = vpop.eup %3395  ;;  %3415 = vpow2.f32 %v2877_v6  ;;  %v2879_v18 = vmul.f32 -1.442695, %v4069_v45 }
 0x129   : > { %v3398_v19 = vpop.eup %3397  ;;  %3417 = vrcp.f32 %v1151_v43  ;;  %v2878_v20 = vmul.f32 -1.442695, %v4072_v14  ;;  %v3107_v21 = vpop.f32.mrb[22].mxu0  ;;  %v1337_v22 = vmul.f32 %v3396_v16, %v4010_v51 }
 0x12a   : > { %v3400_v23 = vpop.eup %3399  ;;  %3419 = vpow2.f32 %v2876_v11  ;;  %v4079_v27 = vadd.f32 %v3107_v21, %v3980_v29  ;;  %v738_v28 = vpop.f32.mrb[23].mxu0  ;;  %v1340_v46 = vmul.f32 %v3398_v19, %v4015_v59 }
 0x12b   : > { %v3402_v30 = vpop.eup %3401  ;;  %v1154_v34 = vadd.f32 1.0, %v3400_v23  ;;  %3421 = vpow2.f32 %v2879_v18  ;;  %3209 = vmatprep.mubr.f32.mxu1 %v1337_v22  ;;  %v4082_v35 = vadd.f32 %v738_v28, %v3980_v29 }
 0x12c   : > { %v3404_v36 = vpop.eup %3403  ;;  %v1153_v38 = vadd.f32 1.0, %v3402_v30  ;;  %3423 = vpow2.f32 %v2878_v20  ;;  %v2881_v51 = vmul.f32 -1.442695, %v4079_v27  ;;  %3210 = vmatmul.mubr.f32.vlgmr.msra.gmra.mrb[0].mxu1 %v1338_v24 }
 0x12d   : > { %v3406_v40 = vpop.eup %3405  ;;  %v1339_v49 = vmul.f32 %v3404_v36, %v4018_v61  ;;  %3425 = vrcp.f32 %v1154_v34  ;;  %v2880_v41 = vmul.f32 -1.442695, %v4082_v35  ;;  %v3110_v42 = vpop.f32.mrb[24].mxu0 }
 0x12e   : > { %v3408_v44 = vpop.eup %3407  ;;  %3427 = vrcp.f32 %v1153_v38  ;;  %v4089_v47 = vadd.f32 %v3110_v42, %v3980_v29  ;;  %v748_v48 = vpop.f32.mrb[25].mxu0  ;;  %v1342_v62 = vmul.f32 %v3406_v40, %v4023_v5 }
 0x12f   : > { %v3410_v31 = vpop.eup %3409  ;;  %v1156_v52 = vadd.f32 1.0, %v3408_v44  ;;  %3429 = vpow2.f32 %v2881_v51  ;;  %3212 = vmatprep.mubr.f32.mxu1 %v1339_v49  ;;  %v4092_v53 = vadd.f32 %v748_v48, %v3980_v29 }
 0x130   : > { %v3412_v61 = vpop.eup %3411  ;;  %v1155_v54 = vadd.f32 1.0, %v3410_v31  ;;  %3431 = vpow2.f32 %v2880_v41  ;;  %v2883_v55 = vmul.f32 -1.442695, %v4089_v47  ;;  %3213 = vmatmul.mubr.f32.gmra.mrb[2].mxu1 %v1340_v46 }
 0x131   : > { %v3414_v56 = vpop.eup %3413  ;;  %v1341_v59 = vmul.f32 %v3412_v61, %v4026_v7  ;;  %3433 = vrcp.f32 %v1156_v52  ;;  %v2882_v57 = vmul.f32 -1.442695, %v4092_v53  ;;  %v3113_v58 = vpop.f32.mrb[26].mxu0 }
 0x132   : > { %v3416_v60 = vpop.eup %3415  ;;  %3435 = vrcp.f32 %v1155_v54  ;;  %v4099_v63 = vadd.f32 %v3113_v58, %v3980_v29  ;;  %v758_v0 = vpop.f32.mrb[27].mxu0  ;;  %v1344_v8 = vmul.f32 %v3414_v56, %v4031_v15 }
 0x133   : > { %v3418_v37 = vpop.eup %3417  ;;  %v1158_v2 = vadd.f32 1.0, %v3416_v60  ;;  %3437 = vpow2.f32 %v2883_v55  ;;  %3215 = vmatprep.mubr.f32.mxu1 %v1341_v59  ;;  %v4102_v3 = vadd.f32 %v758_v0, %v3980_v29 }
 0x134   : > { %v3420_v7 = vpop.eup %3419  ;;  %v1343_v4 = vmul.f32 %v3418_v37, %v4034_v17  ;;  %3439 = vpow2.f32 %v2882_v57  ;;  %v2885_v6 = vmul.f32 -1.442695, %v4099_v63  ;;  %3216 = vmatmul.mubr.f32.gmra.mrb[4].mxu1 %v1342_v62 }
 0x135   : > { %v3422_v5 = vpop.eup %3421  ;;  %3441 = vrcp.f32 %v1158_v2  ;;  %v1157_v9 = vadd.f32 1.0, %v3420_v7  ;;  %v3116_v10 = vpop.f32.mrb[28].mxu0  ;;  %v2884_v13 = vmul.f32 -1.442695, %v4102_v3 }
 0x136   : > { %v3424_v11 = vpop.eup %3423  ;;  %v1160_v12 = vadd.f32 1.0, %v3422_v5  ;;  %3443 = vpow2.f32 %v2885_v6  ;;  %v4109_v43 = vadd.f32 %v3116_v10, %v3980_v29  ;;  %3218 = vmatprep.mubr.f32.mxu1 %v1343_v4  ;;  %v768_v17 = vpop.f32.mrb[29].mxu0 }
 0x137   : > { %v3426_v16 = vpop.eup %3425  ;;  %3445 = vrcp.f32 %v1157_v9  ;;  %v1159_v18 = vadd.f32 1.0, %v3424_v11  ;;  %v4112_v19 = vadd.f32 %v768_v17, %v3980_v29 }
 0x138   : > { %v3428_v15 = vpop.eup %3427  ;;  %3447 = vrcp.f32 %v1160_v12  ;;  %v2887_v20 = vmul.f32 -1.442695, %v4109_v43  ;;  %3219 = vmatmul.mubr.f32.gmra.mrb[6].mxu1 %v1344_v8  ;;  %v1346_v22 = vmul.f32 %v3426_v16, %v4039_v25 }
 0x139   : > { %v3430_v21 = vpop.eup %3429  ;;  %v1345_v23 = vmul.f32 %v3428_v15, %v4043_v32  ;;  %3449 = vrcp.f32 %v1159_v18  ;;  %v3119_v24 = vpop.f32.mrb[30].mxu0  ;;  %v2886_v34 = vmul.f32 -1.442695, %v4112_v19 }
 0x13a   : > { %v3432_v28 = vpop.eup %3431  ;;  %v1162_v30 = vadd.f32 1.0, %v3430_v21  ;;  %3451 = vpow2.f32 %v2884_v13  ;;  %v4119_v36 = vadd.f32 %v3119_v24, %v3980_v29  ;;  %v778_v38 = vpop.f32.mrb[31].mxu0 }
 0x13b   : > { %v3434_v51 = vpop.eup %3433  ;;  %v1161_v40 = vadd.f32 1.0, %v3432_v28  ;;  %3453 = vpow2.f32 %v2887_v20  ;;  %3221 = vmatprep.mubr.f32.mxu1 %v1345_v23  ;;  %v4122_v49 = vadd.f32 %v778_v38, %v3980_v29 }
 0x13c   : > { %v3436_v25 = vpop.eup %3435  ;;  %3455 = vrcp.f32 %v1162_v30  ;;  %v2889_v32 = vmul.f32 -1.442695, %v4119_v36  ;;  %3222 = vmatmul.mubr.f32.gmra.mrb[8].mxu1 %v1346_v22  ;;  %v1348_v42 = vmul.f32 %v3434_v51, %v4049_v33 }
 0x13d   : > { %v3438_v41 = vpop.eup %3437  ;;  %v1347_v44 = vmul.f32 %v3436_v25, %v4053_v50  ;;  %3457 = vrcp.f32 %v1161_v40  ;;  %v3122_v46 = vpop.f32.mrb[32].mxu0  ;;  %v2888_v52 = vmul.f32 -1.442695, %v4122_v49 }
 0x13e   : > { %v3440_v48 = vpop.eup %3439  ;;  %v1164_v31 = vadd.f32 1.0, %v3438_v41  ;;  %3459 = vpow2.f32 %v2886_v34  ;;  %v4129_v61 = vadd.f32 %v3122_v46, %v3980_v29  ;;  %v788_v54 = vpop.f32.mrb[33].mxu0 }
 0x13f   : > { %v3442_v55 = vpop.eup %3441  ;;  %v1163_v56 = vadd.f32 1.0, %v3440_v48  ;;  %3461 = vpow2.f32 %v2889_v32  ;;  %3224 = vmatprep.mubr.f32.mxu1 %v1347_v44  ;;  %v4132_v59 = vadd.f32 %v788_v54, %v3980_v29 }
 0x140   : > { %v3444_v33 = vpop.eup %3443  ;;  %3463 = vrcp.f32 %v1164_v31  ;;  %v2891_v50 = vmul.f32 -1.442695, %v4129_v61  ;;  %3225 = vmatmul.mubr.f32.gmra.mrb[10].mxu1 %v1348_v42  ;;  %v1350_v6 = vmul.f32 %v3442_v55, %v4059_v39 }
 0x141   : > { %v3446_v57 = vpop.eup %3445  ;;  %3465 = vrcp.f32 %v1163_v56  ;;  %v1166_v58 = vadd.f32 1.0, %v3444_v33  ;;  %v2890_v60 = vmul.f32 -1.442695, %v4132_v59  ;;  %v3125_v62 = vpop.f32.mrb[34].mxu0 }
 0x142   : > { %v3448_v0 = vpop.eup %3447  ;;  %v1349_v37 = vmul.f32 %v3446_v57, %v4063_v1  ;;  %3467 = vpow2.f32 %v2888_v52  ;;  %v4138_v2 = vadd.f32 %v3125_v62, %v3980_v29  ;;  %v798_v7 = vpop.f32.mrb[35].mxu0 }
 0x143   : > { %v3450_v4 = vpop.eup %3449  ;;  %3469 = vrcp.f32 %v1166_v58  ;;  %v4142_v5 = vadd.f32 %v798_v7, %v3980_v29  ;;  %v1352_v15 = vmul.f32 %v3448_v0, %v4069_v45 }
 0x144   : > { %v3452_v8 = vpop.eup %3451  ;;  %v1351_v9 = vmul.f32 %v3450_v4, %v4072_v14  ;;  %3471 = vpow2.f32 %v2891_v50  ;;  %v2893_v10 = vmul.f32 -1.442695, %v4138_v2  ;;  %3227 = vmatprep.mubr.f32.mxu1 %v1349_v37 }
 0x145   : > { %v3454_v1 = vpop.eup %3453  ;;  %v1165_v11 = vadd.f32 1.0, %v3452_v8  ;;  %3473 = vpow2.f32 %v2890_v60  ;;  %v2892_v12 = vmul.f32 -1.442695, %v4142_v5  ;;  %3228 = vmatmul.mubr.f32.gmra.mrb[12].mxu1 %v1350_v6  ;;  %v3128_v13 = vpop.f32.mrb[36].mxu0 }
 0x146   : > { %v3456_v17 = vpop.eup %3455  ;;  %v1168_v39 = vadd.f32 1.0, %v3454_v1  ;;  %3475 = vpow2.f32 %v2893_v10  ;;  %v4148_v16 = vadd.f32 %v3128_v13, %v3980_v29  ;;  %3230 = vmatprep.mubr.f32.mxu1 %v1351_v9  ;;  %v808_v18 = vpop.f32.mrb[37].mxu0 }
 0x147   : > { %v3458_v14 = vpop.eup %3457  ;;  %3477 = vrcp.f32 %v1165_v11  ;;  %v4152_v20 = vadd.f32 %v808_v18, %v3980_v29 }
 0x148   : > { %v3460_v21 = vpop.eup %3459  ;;  %v1353_v22 = vmul.f32 %v3458_v14, %v4082_v35  ;;  %3479 = vrcp.f32 %v1168_v39  ;;  %v2895_v23 = vmul.f32 -1.442695, %v4148_v16  ;;  %v1354_v35 = vmul.f32 %v3456_v17, %v4079_v27 }
 0x149   : > { %v3462_v24 = vpop.eup %3461  ;;  %v1167_v28 = vadd.f32 1.0, %v3460_v21  ;;  %3481 = vpow2.f32 %v2892_v12  ;;  %v2894_v30 = vmul.f32 -1.442695, %v4152_v20  ;;  %3231 = vmatmul.mubr.f32.gmra.mrb[14].mxu1 %v1352_v15  ;;  %v3131_v34 = vpop.f32.mrb[38].mxu0 }
 0x14a   : > { %v3464_v38 = vpop.eup %3463  ;;  %v1170_v51 = vadd.f32 1.0, %v3462_v24  ;;  %3483 = vpow2.f32 %v2895_v23  ;;  %v4158_v45 = vadd.f32 %v3131_v34, %v3980_v29  ;;  %3233 = vmatprep.mubr.f32.mxu1 %v1353_v22  ;;  %v818_v40 = vpop.f32.mrb[39].mxu0 }
 0x14b   : > { %v3466_v25 = vpop.eup %3465  ;;  %3485 = vrcp.f32 %v1167_v28  ;;  %v4162_v32 = vadd.f32 %v818_v40, %v3980_v29 }
 0x14c   : > { %v3468_v41 = vpop.eup %3467  ;;  %v1355_v42 = vmul.f32 %v3466_v25, %v4092_v53  ;;  %3487 = vrcp.f32 %v1170_v51  ;;  %v2897_v44 = vmul.f32 -1.442695, %v4158_v45  ;;  %v1356_v53 = vmul.f32 %v3464_v38, %v4089_v47 }
 0x14d   : > { %v3470_v46 = vpop.eup %3469  ;;  %v1169_v48 = vadd.f32 1.0, %v3468_v41  ;;  %3489 = vpow2.f32 %v2894_v30  ;;  %v2896_v31 = vmul.f32 -1.442695, %v4162_v32  ;;  %3234 = vmatmul.mubr.f32.gmra.mrb[16].mxu1 %v1354_v35  ;;  %v3134_v52 = vpop.f32.mrb[40].mxu0 }
 0x14e   : > { %v3472_v54 = vpop.eup %3471  ;;  %3491 = vpow2.f32 %v2897_v44  ;;  %v4168_v27 = vadd.f32 %v3134_v52, %v3980_v29  ;;  %3236 = vmatprep.mubr.f32.mxu1 %v1355_v42  ;;  %v828_v55 = vpop.f32.mrb[41].mxu0  ;;  %v1358_v10 = vmul.f32 %v3470_v46, %v4099_v63 }
 0x14f   : > { %v3474_v56 = vpop.eup %3473  ;;  %3493 = vrcp.f32 %v1169_v48  ;;  %v1172_v33 = vadd.f32 1.0, %v3472_v54  ;;  %v4172_v50 = vadd.f32 %v828_v55, %v3980_v29 }
 0x150   : > { %v3476_v57 = vpop.eup %3475  ;;  %v1171_v58 = vadd.f32 1.0, %v3474_v56  ;;  %3495 = vpow2.f32 %v2896_v31  ;;  %v2899_v60 = vmul.f32 -1.442695, %v4168_v27 }
 0x151   : > { %v3478_v62 = vpop.eup %3477  ;;  %3497 = vrcp.f32 %v1172_v33  ;;  %v1174_v0 = vadd.f32 1.0, %v3476_v57  ;;  %v2898_v37 = vmul.f32 -1.442695, %v4172_v50  ;;  %3237 = vmatmul.mubr.f32.gmra.mrb[18].mxu1 %v1356_v53  ;;  %v3137_v7 = vpop.f32.mrb[42].mxu0 }
 0x152   : > { %v3480_v4 = vpop.eup %3479  ;;  %v1357_v47 = vmul.f32 %v3478_v62, %v4102_v3  ;;  %3499 = vrcp.f32 %v1171_v58  ;;  %v4178_v6 = vadd.f32 %v3137_v7, %v3980_v29  ;;  %v838_v8 = vpop.f32.mrb[43].mxu0 }
 0x153   : > { %v3482_v9 = vpop.eup %3481  ;;  %3501 = vrcp.f32 %v1174_v0  ;;  %v4182_v1 = vadd.f32 %v838_v8, %v3980_v29  ;;  %v1360_v23 = vmul.f32 %v3480_v4, %v4109_v43 }
 0x154   : > { %v3484_v11 = vpop.eup %3483  ;;  %v1173_v12 = vadd.f32 1.0, %v3482_v9  ;;  %3503 = vpow2.f32 %v2899_v60  ;;  %v2901_v13 = vmul.f32 -1.442695, %v4178_v6  ;;  %3239 = vmatprep.mubr.f32.mxu1 %v1357_v47 }
 0x155   : > { %v3486_v17 = vpop.eup %3485  ;;  %v1176_v3 = vadd.f32 1.0, %v3484_v11  ;;  %3505 = vpow2.f32 %v2898_v37  ;;  %v2900_v39 = vmul.f32 -1.442695, %v4182_v1  ;;  %3240 = vmatmul.mubr.f32.gmra.mrb[20].mxu1 %v1358_v10  ;;  %v3140_v18 = vpop.f32.mrb[44].mxu0 }
 0x156   : > { %v3488_v14 = vpop.eup %3487  ;;  %v1359_v63 = vmul.f32 %v3486_v17, %v4112_v19  ;;  %3507 = vrcp.f32 %v1173_v12  ;;  %v4188_v15 = vadd.f32 %v3140_v18, %v3980_v29  ;;  %v848_v21 = vpop.f32.mrb[45].mxu0 }
 0x157   : > { %v3490_v22 = vpop.eup %3489  ;;  %3509 = vrcp.f32 %v1176_v3  ;;  %v4192_v24 = vadd.f32 %v848_v21, %v3980_v29  ;;  %v1362_v44 = vmul.f32 %v3488_v14, %v4119_v36 }
 0x158   : > { %v3492_v28 = vpop.eup %3491  ;;  %v1175_v30 = vadd.f32 1.0, %v3490_v22  ;;  %3511 = vpow2.f32 %v2901_v13  ;;  %v2903_v34 = vmul.f32 -1.442695, %v4188_v15  ;;  %3242 = vmatprep.mubr.f32.mxu1 %v1359_v63 }
 0x159   : > { %v3494_v38 = vpop.eup %3493  ;;  %v1178_v19 = vadd.f32 1.0, %v3492_v28  ;;  %3513 = vpow2.f32 %v2900_v39  ;;  %3243 = vmatmul.mubr.f32.gmra.mrb[22].mxu1 %v1360_v23  ;;  %v3143_v51 = vpop.f32.mrb[46].mxu0  ;;  %v2902_v43 = vmul.f32 -1.442695, %v4192_v24 }
 0x15a   : > { %v3496_v40 = vpop.eup %3495  ;;  %v1361_v25 = vmul.f32 %v3494_v38, %v4122_v49  ;;  %3515 = vrcp.f32 %v1175_v30  ;;  %v4198_v35 = vadd.f32 %v3143_v51, %v3980_v29  ;;  %v858_v41 = vpop.f32.mrb[47].mxu0 }
 0x15b   : > { %v3498_v42 = vpop.eup %3497  ;;  %3517 = vrcp.f32 %v1178_v19  ;;  %v1177_v46 = vadd.f32 1.0, %v3496_v40  ;;  %v4202_v48 = vadd.f32 %v858_v41, %v3980_v29 }
 0x15c   : > { %v3500_v31 = vpop.eup %3499  ;;  %3519 = vpow2.f32 %v2903_v34  ;;  %v2905_v52 = vmul.f32 -1.442695, %v4198_v35  ;;  %3245 = vmatprep.mubr.f32.mxu1 %v1361_v25  ;;  %v1364_v58 = vmul.f32 %v3498_v42, %v4129_v61 }
 0x15d   : > { %v3502_v49 = vpop.eup %3501  ;;  %v1363_v54 = vmul.f32 %v3500_v31, %v4132_v59  ;;  %3521 = vrcp.f32 %v1177_v46  ;;  %v2904_v55 = vmul.f32 -1.442695, %v4202_v48  ;;  %3246 = vmatmul.mubr.f32.gmra.mrb[24].mxu1 %v1362_v44  ;;  %v3146_v56 = vpop.f32.mrb[48].mxu0 }
 0x15e   : > { %v3504_v53 = vpop.eup %3503  ;;  %3523 = vpow2.f32 %v2902_v43  ;;  %v4208_v36 = vadd.f32 %v3146_v56, %v3980_v29  ;;  %v868_v33 = vpop.f32.mrb[49].mxu0  ;;  %v1366_v12 = vmul.f32 %v3502_v49, %v4138_v2 }
 0x15f   : > { %v3506_v57 = vpop.eup %3505  ;;  %v1180_v60 = vadd.f32 1.0, %v3504_v53  ;;  %3525 = vpow2.f32 %v2905_v52  ;;  %3248 = vmatprep.mubr.f32.mxu1 %v1363_v54  ;;  %v4212_v62 = vadd.f32 %v868_v33, %v3980_v29 }
 0x160   : > { %v3508_v59 = vpop.eup %3507  ;;  %v1179_v0 = vadd.f32 1.0, %v3506_v57  ;;  %3527 = vpow2.f32 %v2904_v55  ;;  %v2907_v37 = vmul.f32 -1.442695, %v4208_v36 }
 0x161   : > { %v3510_v7 = vpop.eup %3509  ;;  %v1365_v4 = vmul.f32 %v3508_v59, %v4142_v5  ;;  %3529 = vrcp.f32 %v1180_v60  ;;  %v2906_v47 = vmul.f32 -1.442695, %v4212_v62  ;;  %3249 = vmatmul.mubr.f32.gmra.mrb[26].mxu1 %v1364_v58  ;;  %v3149_v8 = vpop.f32.mrb[50].mxu0 }
 0x162   : > { %v3512_v61 = vpop.eup %3511  ;;  %3531 = vrcp.f32 %v1179_v0  ;;  %v4218_v9 = vadd.f32 %v3149_v8, %v3980_v29  ;;  %v878_v10 = vpop.f32.mrb[51].mxu0  ;;  %v1368_v30 = vmul.f32 %v3510_v7, %v4148_v16 }
 0x163   : > { %v3514_v11 = vpop.eup %3513  ;;  %v1182_v13 = vadd.f32 1.0, %v3512_v61  ;;  %3533 = vpow2.f32 %v2907_v37  ;;  %3251 = vmatprep.mubr.f32.mxu1 %v1365_v4  ;;  %v4222_v17 = vadd.f32 %v878_v10, %v3980_v29 }
 0x164   : > { %v3516_v5 = vpop.eup %3515  ;;  %v1181_v3 = vadd.f32 1.0, %v3514_v11  ;;  %3535 = vpow2.f32 %v2906_v47  ;;  %v2909_v39 = vmul.f32 -1.442695, %v4218_v9 }
 0x165   : > { %v3518_v18 = vpop.eup %3517  ;;  %v1367_v14 = vmul.f32 %v3516_v5, %v4152_v20  ;;  %3537 = vrcp.f32 %v1182_v13  ;;  %v2908_v63 = vmul.f32 -1.442695, %v4222_v17  ;;  %3252 = vmatmul.mubr.f32.gmra.mrb[28].mxu1 %v1366_v12  ;;  %v3152_v21 = vpop.f32.mrb[52].mxu0 }
 0x166   : > { %v3520_v2 = vpop.eup %3519  ;;  %3539 = vrcp.f32 %v1181_v3  ;;  %v4228_v22 = vadd.f32 %v3152_v21, %v3980_v29  ;;  %v888_v23 = vpop.f32.mrb[53].mxu0 }
 0x167   : > { %v3522_v28 = vpop.eup %3521  ;;  %v1184_v34 = vadd.f32 1.0, %v3520_v2  ;;  %3541 = vpow2.f32 %v2909_v39  ;;  %3254 = vmatprep.mubr.f32.mxu1 %v1367_v14  ;;  %v4232_v38 = vadd.f32 %v888_v23, %v3980_v29 }
 0x168   : > { %v3524_v20 = vpop.eup %3523  ;;  %v1369_v19 = vmul.f32 %v3522_v28, %v4162_v32  ;;  %3543 = vpow2.f32 %v2908_v63  ;;  %v2911_v51 = vmul.f32 -1.442695, %v4228_v22  ;;  %v1370_v32 = vmul.f32 %v3518_v18, %v4158_v45 }
 0x169   : > { %v3526_v40 = vpop.eup %3525  ;;  %3545 = vrcp.f32 %v1184_v34  ;;  %v1183_v25 = vadd.f32 1.0, %v3524_v20  ;;  %3255 = vmatmul.mubr.f32.gmra.mrb[30].mxu1 %v1368_v30  ;;  %v3155_v43 = vpop.f32.mrb[54].mxu0  ;;  %v2910_v16 = vmul.f32 -1.442695, %v4232_v38 }
 0x16a   : > { %v3528_v41 = vpop.eup %3527  ;;  %v1186_v42 = vadd.f32 1.0, %v3526_v40  ;;  %3547 = vpow2.f32 %v2911_v51  ;;  %v4238_v44 = vadd.f32 %v3155_v43, %v3980_v29  ;;  %3257 = vmatprep.mubr.f32.mxu1 %v1369_v19  ;;  %v898_v46 = vpop.f32.mrb[55].mxu0 }
 0x16b   : > { %v3530_v31 = vpop.eup %3529  ;;  %3549 = vrcp.f32 %v1183_v25  ;;  %v1185_v52 = vadd.f32 1.0, %v3528_v41  ;;  %v4242_v49 = vadd.f32 %v898_v46, %v3980_v29 }
 0x16c   : > { %v3532_v54 = vpop.eup %3531  ;;  %3551 = vrcp.f32 %v1186_v42  ;;  %v2913_v55 = vmul.f32 -1.442695, %v4238_v44  ;;  %v1372_v37 = vmul.f32 %v3530_v31, %v4168_v27 }
 0x16d   : > { %v3534_v56 = vpop.eup %3533  ;;  %v1371_v53 = vmul.f32 %v3532_v54, %v4172_v50  ;;  %3553 = vrcp.f32 %v1185_v52  ;;  %3258 = vmatmul.mubr.f32.gmra.mrb[32].mxu1 %v1370_v32  ;;  %v3158_v33 = vpop.f32.mrb[56].mxu0  ;;  %v2912_v45 = vmul.f32 -1.442695, %v4242_v49 }
 0x16e   : > { %v3536_v57 = vpop.eup %3535  ;;  %v1188_v58 = vadd.f32 1.0, %v3534_v56  ;;  %3555 = vpow2.f32 %v2910_v16  ;;  %v4248_v60 = vadd.f32 %v3158_v33, %v3980_v29  ;;  %v908_v59 = vpop.f32.mrb[57].mxu0 }
 0x16f   : > { %v3538_v0 = vpop.eup %3537  ;;  %v1187_v7 = vadd.f32 1.0, %v3536_v57  ;;  %3557 = vpow2.f32 %v2913_v55  ;;  %3260 = vmatprep.mubr.f32.mxu1 %v1371_v53  ;;  %v4252_v50 = vadd.f32 %v908_v59, %v3980_v29 }
 0x170   : > { %v3540_v4 = vpop.eup %3539  ;;  %3559 = vrcp.f32 %v1188_v58  ;;  %v2915_v47 = vmul.f32 -1.442695, %v4248_v60  ;;  %v1374_v39 = vmul.f32 %v3538_v0, %v4178_v6 }
 0x171   : > { %v3542_v8 = vpop.eup %3541  ;;  %v1373_v61 = vmul.f32 %v3540_v4, %v4182_v1  ;;  %3561 = vrcp.f32 %v1187_v7  ;;  %3261 = vmatmul.mubr.f32.gmra.mrb[34].mxu1 %v1372_v37  ;;  %v3161_v10 = vpop.f32.mrb[58].mxu0  ;;  %v2914_v27 = vmul.f32 -1.442695, %v4252_v50 }
 0x172   : > { %v3544_v11 = vpop.eup %3543  ;;  %v1190_v12 = vadd.f32 1.0, %v3542_v8  ;;  %3563 = vpow2.f32 %v2912_v45  ;;  %v4258_v13 = vadd.f32 %v3161_v10, %v3980_v29  ;;  %v918_v5 = vpop.f32.mrb[59].mxu0 }
 0x173   : > { %v3546_v3 = vpop.eup %3545  ;;  %v1189_v18 = vadd.f32 1.0, %v3544_v11  ;;  %3565 = vpow2.f32 %v2915_v47  ;;  %3263 = vmatprep.mubr.f32.mxu1 %v1373_v61  ;;  %v4262_v1 = vadd.f32 %v918_v5, %v3980_v29 }
 0x174   : > { %v3548_v14 = vpop.eup %3547  ;;  %3567 = vrcp.f32 %v1190_v12  ;;  %v2917_v63 = vmul.f32 -1.442695, %v4258_v13  ;;  %v1376_v51 = vmul.f32 %v3546_v3, %v4188_v15 }
 0x175   : > { %v3550_v21 = vpop.eup %3549  ;;  %3569 = vrcp.f32 %v1189_v18  ;;  %v1192_v2 = vadd.f32 1.0, %v3548_v14  ;;  %v2916_v23 = vmul.f32 -1.442695, %v4262_v1  ;;  %3264 = vmatmul.mubr.f32.gmra.mrb[36].mxu1 %v1374_v39  ;;  %v3164_v28 = vpop.f32.mrb[60].mxu0 }
 0x176   : > { %v3552_v30 = vpop.eup %3551  ;;  %v1375_v6 = vmul.f32 %v3550_v21, %v4192_v24  ;;  %3571 = vpow2.f32 %v2914_v27  ;;  %v4268_v34 = vadd.f32 %v3164_v28, %v3980_v29  ;;  %v928_v20 = vpop.f32.mrb[61].mxu0 }
 0x177   : > { %v3554_v19 = vpop.eup %3553  ;;  %3573 = vrcp.f32 %v1192_v2  ;;  %v4272_v40 = vadd.f32 %v928_v20, %v3980_v29  ;;  %v1378_v54 = vmul.f32 %v3552_v30, %v4198_v35 }
 0x178   : > { %v3556_v25 = vpop.eup %3555  ;;  %v1377_v43 = vmul.f32 %v3554_v19, %v4202_v48  ;;  %3575 = vpow2.f32 %v2917_v63  ;;  %v2919_v41 = vmul.f32 -1.442695, %v4268_v34  ;;  %3266 = vmatprep.mubr.f32.mxu1 %v1375_v6 }
 0x179   : > { %v3558_v24 = vpop.eup %3557  ;;  %v1191_v42 = vadd.f32 1.0, %v3556_v25  ;;  %3577 = vpow2.f32 %v2916_v23  ;;  %v2918_v16 = vmul.f32 -1.442695, %v4272_v40  ;;  %3267 = vmatmul.mubr.f32.gmra.mrb[38].mxu1 %v1376_v51  ;;  %v3167_v46 = vpop.f32.mrb[62].mxu0 }
 0x17a   : > { %v3560_v31 = vpop.eup %3559  ;;  %v1194_v15 = vadd.f32 1.0, %v3558_v24  ;;  %3579 = vpow2.f32 %v2919_v41  ;;  %v4278_v32 = vadd.f32 %v3167_v46, %v3980_v29  ;;  %3269 = vmatprep.mubr.f32.mxu1 %v1377_v43  ;;  %v938_v52 = vpop.f32.mrb[63].mxu0 }
 0x17b   : > { %v3562_v48 = vpop.eup %3561  ;;  %3581 = vrcp.f32 %v1191_v42  ;;  %v4282_v55 = vadd.f32 %v938_v52, %v3980_v29  ;;  %v1380_v29 = vmul.f32 %v3560_v31, %v4208_v36  ;;  %v1397_v42 = vsub.s32 1, %v3971_v26 }
 0x17c   : > { %v3564_v56 = vpop.eup %3563  ;;  %v1379_v53 = vmul.f32 %v3562_v48, %v4212_v62  ;;  %3583 = vrcp.f32 %v1194_v15  ;;  %v2921_v33 = vmul.f32 -1.442695, %v4278_v32 }
 0x17d   : > { %v3566_v57 = vpop.eup %3565  ;;  %v1193_v58 = vadd.f32 1.0, %v3564_v56  ;;  %3585 = vpow2.f32 %v2918_v16  ;;  %v2920_v45 = vmul.f32 -1.442695, %v4282_v55  ;;  %3270 = vmatmul.mubr.f32.gmra.mrb[40].mxu1 %v1378_v54 }
 0x17e   : > { %v3568_v59 = vpop.eup %3567  ;;  %v1196_v0 = vadd.f32 1.0, %v3566_v57  ;;  %3587 = vpow2.f32 %v2921_v33  ;;  %3272 = vmatprep.mubr.f32.mxu1 %v1379_v53 }
 0x17f   : > { %v3570_v35 = vpop.eup %3569  ;;  %3589 = vrcp.f32 %v1193_v58  ;;  %v1382_v61 = vmul.f32 %v3568_v59, %v4218_v9 }
 0x180   : > { %v3572_v37 = vpop.eup %3571  ;;  %v1381_v62 = vmul.f32 %v3570_v35, %v4222_v17  ;;  %3591 = vpow2.f32 %v2920_v45 }
 0x181   : > { %v3574_v7 = vpop.eup %3573  ;;  %v1195_v4 = vadd.f32 1.0, %v3572_v37  ;;  %3273 = vmatmul.mubr.f32.gmra.mrb[42].mxu1 %v1380_v29  ;;  %3593 = vrcp.f32 %v1196_v0 }
 0x182   : > { %v3576_v47 = vpop.eup %3575  ;;  %3275 = vmatprep.mubr.f32.mxu1 %v1381_v62  ;;  %v1384_v39 = vmul.f32 %v3574_v7, %v4228_v22 }
 0x183   : > { %v3578_v8 = vpop.eup %3577  ;;  %3595 = vrcp.f32 %v1195_v4  ;;  %v1198_v10 = vadd.f32 1.0, %v3576_v47 }
 0x184   : > { %v3580_v11 = vpop.eup %3579  ;;  %v1197_v12 = vadd.f32 1.0, %v3578_v8 }
 0x185   : > { %v3582_v27 = vpop.eup %3581  ;;  %3597 = vrcp.f32 %v1198_v10  ;;  %v1200_v36 = vadd.f32 1.0, %v3580_v11  ;;  %3276 = vmatmul.mubr.f32.gmra.mrb[44].mxu1 %v1382_v61 }
 0x186   : > { %v3584_v5 = vpop.eup %3583  ;;  %v1383_v17 = vmul.f32 %v3582_v27, %v4232_v38  ;;  %3599 = vrcp.f32 %v1197_v12 }
 0x187   : > { %v3586_v3 = vpop.eup %3585  ;;  %3601 = vrcp.f32 %v1200_v36  ;;  %v1386_v23 = vmul.f32 %v3584_v5, %v4238_v44 }
 0x188   : > { %v3588_v18 = vpop.eup %3587  ;;  %v1199_v14 = vadd.f32 1.0, %v3586_v3  ;;  %3278 = vmatprep.mubr.f32.mxu1 %v1383_v17 }
 0x189   : > { %v3590_v63 = vpop.eup %3589  ;;  %v1202_v9 = vadd.f32 1.0, %v3588_v18  ;;  %3279 = vmatmul.mubr.f32.gmra.mrb[46].mxu1 %v1384_v39 }
 0x18a   : > { %v1385_v21 = vmul.f32 %v3590_v63, %v4242_v49  ;;  %3603 = vrcp.f32 %v1199_v14  ;;  %v3592_v2 = vpop.eup %3591 }
 0x18b   : > { %v3594_v28 = vpop.eup %3593  ;;  %v1201_v30 = vadd.f32 1.0, %v3592_v2  ;;  %3605 = vrcp.f32 %v1202_v9 }
 0x18c   : > { %3281 = vmatprep.mubr.f32.mxu1 %v1385_v21  ;;  %v1388_v20 = vmul.f32 %v3594_v28, %v4248_v60 }
 0x18d   : > { %v3596_v38 = vpop.eup %3595  ;;  %3282 = vmatmul.mubr.f32.gmra.mrb[48].mxu1 %v1386_v23  ;;  %3607 = vrcp.f32 %v1201_v30 }
 0x18e   : > { %v1387_v22 = vmul.f32 %v3596_v38, %v4252_v50 }
 0x18f   : > { %v3598_v6 = vpop.eup %3597 }
 0x190   : > { %v3600_v19 = vpop.eup %3599  ;;  %3284 = vmatprep.mubr.f32.mxu1 %v1387_v22  ;;  %v1390_v44 = vmul.f32 %v3598_v6, %v4258_v13  ;;  %v3737_v13 = vld [vmem:[%s3976_s18] sm:$0xf] }
 0x191   : > { %v1389_v49 = vmul.f32 %v3600_v19, %v4262_v1  ;;  %3285 = vmatmul.mubr.f32.gmra.mrb[50].mxu1 %v1388_v20  ;;  %v3602_v51 = vpop.eup %3601  ;;  %v4304_v16 = vrot.slane %v3737_v13, %v1397_v42 }
 0x192   : > { %v1392_v50 = vmul.f32 %v3602_v51, %v4268_v34 }
 0x193   : > { %3287 = vmatprep.mubr.f32.mxu1 %v1389_v49 }
 0x194   : > { %v3604_v25 = vpop.eup %3603 }
 0x195   : > { %v1391_v43 = vmul.f32 %v3604_v25, %v4272_v40  ;;  %3288 = vmatmul.mubr.f32.gmra.mrb[52].mxu1 %v1390_v44  ;;  %v3606_v41 = vpop.eup %3605 }
 0x196   : > { %v1394_v1 = vmul.f32 %v3606_v41, %v4278_v32 }
 0x197   : > { %3290 = vmatprep.mubr.f32.mxu1 %v1391_v43  ;;  %v3608_v24 = vpop.eup %3607 }
 0x198   : > { %v1393_v60 = vmul.f32 %v3608_v24, %v4282_v55 }
 0x199   : > { %3291 = vmatmul.mubr.f32.gmra.mrb[54].mxu1 %v1392_v50 }
 0x19a   : > { %3293 = vmatprep.mubr.f32.mxu1 %v1393_v60 }
 0x19d   : > { %3294 = vmatmul.mubr.f32.gmra.mrb[56].mxu1 %v1394_v1 }
 0x1f1   : > { %v3202_v46 = vpop.f32.mrb[64].mxu0 }
 0x1f2   : > { %v4307_v40 = vadd.f32 %v3202_v46, %v4304_v16  ;;  %v1465_v31 = vpop.f32.mrb[65].mxu0 }
 0x1f3   : > { %v4311_v15 = vadd.f32 %v1465_v31, %v4304_v16 }
 0x1f4   : > { %1786 = vadd.xlane.f32.xlu0 %v4307_v40 }
 0x1f5   : > { %v3205_v34 = vpop.f32.mrb[66].mxu0 }
 0x1f6   : > { %v4314_v32 = vadd.f32 %v3205_v34, %v4304_v16  ;;  %v1475_v52 = vpop.f32.mrb[67].mxu0 }
 0x1f7   : > { %v4319_v54 = vadd.f32 %v1475_v52, %v4304_v16 }
 0x1f8   : > { %1790 = vadd.xlane.f32.xlu1 %v4314_v32  ;;  %1784 = vadd.xlane.f32.xlu0 %v4311_v15 }
 0x1f9   : > { %v3208_v48 = vpop.f32.mrb[68].mxu0 }
 0x1fa   : > { %v1485_v55 = vpop.f32.mrb[69].mxu0  ;;  %v4327_v53 = vadd.f32 %v3208_v48, %v4304_v16 }
 0x1fb   : > { %v4322_v56 = vadd.f32 %v1485_v55, %v4304_v16 }
 0x1fc   : > { %1788 = vadd.xlane.f32.xlu1 %v4319_v54 }
 0x1fd   : > { %1792 = vadd.xlane.f32.xlu0 %v4322_v56 }
 0x1ff   : > { %v3211_v33 = vpop.f32.mrb[0].mxu1 }
 0x200   : > { %v1495_v57 = vpop.f32.mrb[1].mxu1  ;;  %1794 = vadd.xlane.f32.xlu1 %v4327_v53  ;;  %v4334_v45 = vadd.f32 %v3211_v33, %v4304_v16 }
 0x201   : > { %v4331_v58 = vadd.f32 %v1495_v57, %v4304_v16 }
 0x203   : > { %v3214_v59 = vpop.f32.mrb[2].mxu1  ;;  %1796 = vadd.xlane.f32.xlu0 %v4331_v58 }
 0x204   : > { %v1505_v0 = vpop.f32.mrb[3].mxu1  ;;  %1798 = vadd.xlane.f32.xlu1 %v4334_v45  ;;  %v4342_v29 = vadd.f32 %v3214_v59, %v4304_v16 }
 0x205   : > { %v4339_v35 = vadd.f32 %v1505_v0, %v4304_v16 }
 0x207   : > { %v3217_v37 = vpop.f32.mrb[4].mxu1  ;;  %1800 = vadd.xlane.f32.xlu0 %v4339_v35 }
 0x208   : > { %v1515_v62 = vpop.f32.mrb[5].mxu1  ;;  %1802 = vadd.xlane.f32.xlu1 %v4342_v29  ;;  %v4350_v4 = vadd.f32 %v3217_v37, %v4304_v16 }
 0x209   : > { %v4347_v7 = vadd.f32 %v1515_v62, %v4304_v16 }
 0x20b   : > { %v3220_v47 = vpop.f32.mrb[6].mxu1  ;;  %1804 = vadd.xlane.f32.xlu0 %v4347_v7 }
 0x20c   : > { %v1525_v8 = vpop.f32.mrb[7].mxu1  ;;  %1806 = vadd.xlane.f32.xlu1 %v4350_v4  ;;  %v4358_v10 = vadd.f32 %v3220_v47, %v4304_v16 }
 0x20d   : > { %v4355_v61 = vadd.f32 %v1525_v8, %v4304_v16 }
 0x20f   : > { %v3223_v11 = vpop.f32.mrb[8].mxu1  ;;  %1808 = vadd.xlane.f32.xlu0 %v4355_v61 }
 0x210   : > { %v1535_v12 = vpop.f32.mrb[9].mxu1  ;;  %1810 = vadd.xlane.f32.xlu1 %v4358_v10  ;;  %v4366_v36 = vadd.f32 %v3223_v11, %v4304_v16 }
 0x211   : > { %v4363_v27 = vadd.f32 %v1535_v12, %v4304_v16 }
 0x213   : > { %v3226_v5 = vpop.f32.mrb[10].mxu1  ;;  %1812 = vadd.xlane.f32.xlu0 %v4363_v27 }
 0x214   : > { %v1545_v17 = vpop.f32.mrb[11].mxu1  ;;  %1814 = vadd.xlane.f32.xlu1 %v4366_v36  ;;  %v4374_v39 = vadd.f32 %v3226_v5, %v4304_v16 }
 0x215   : > { %v4371_v3 = vadd.f32 %v1545_v17, %v4304_v16 }
 0x217   : > { %1816 = vadd.xlane.f32.xlu0 %v4371_v3 }
 0x218   : > { %v3229_v18 = vpop.f32.mrb[12].mxu1  ;;  %1818 = vadd.xlane.f32.xlu1 %v4374_v39 }
 0x219   : > { %v1555_v14 = vpop.f32.mrb[13].mxu1  ;;  %v4379_v63 = vadd.f32 %v3229_v18, %v4304_v16 }
 0x21a   : > { %v4382_v9 = vadd.f32 %v1555_v14, %v4304_v16 }
 0x21c   : > { %v3232_v21 = vpop.f32.mrb[14].mxu1  ;;  %1820 = vadd.xlane.f32.xlu0 %v4382_v9  ;;  %1822 = vadd.xlane.f32.xlu1 %v4379_v63 }
 0x21d   : > { %v1565_v2 = vpop.f32.mrb[15].mxu1  ;;  %v4387_v23 = vadd.f32 %v3232_v21, %v4304_v16 }
 0x21e   : > { %v4390_v28 = vadd.f32 %v1565_v2, %v4304_v16 }
 0x220   : > { %v3235_v30 = vpop.f32.mrb[16].mxu1  ;;  %1824 = vadd.xlane.f32.xlu0 %v4390_v28  ;;  %1826 = vadd.xlane.f32.xlu1 %v4387_v23 }
 0x221   : > { %v1575_v38 = vpop.f32.mrb[17].mxu1  ;;  %v4395_v22 = vadd.f32 %v3235_v30, %v4304_v16 }
 0x222   : > { %v4398_v6 = vadd.f32 %v1575_v38, %v4304_v16 }
 0x224   : > { %v3238_v20 = vpop.f32.mrb[18].mxu1  ;;  %1828 = vadd.xlane.f32.xlu0 %v4398_v6  ;;  %1830 = vadd.xlane.f32.xlu1 %v4395_v22 }
 0x225   : > { %v1585_v19 = vpop.f32.mrb[19].mxu1  ;;  %v4403_v49 = vadd.f32 %v3238_v20, %v4304_v16 }
 0x226   : > { %v4406_v51 = vadd.f32 %v1585_v19, %v4304_v16 }
 0x228   : > { %v3241_v44 = vpop.f32.mrb[20].mxu1  ;;  %1832 = vadd.xlane.f32.xlu0 %v4406_v51  ;;  %1834 = vadd.xlane.f32.xlu1 %v4403_v49 }
 0x229   : > { %v1595_v25 = vpop.f32.mrb[21].mxu1  ;;  %v4411_v43 = vadd.f32 %v3241_v44, %v4304_v16 }
 0x22a   : > { %v4414_v41 = vadd.f32 %v1595_v25, %v4304_v16 }
 0x22c   : > { %v3244_v50 = vpop.f32.mrb[22].mxu1  ;;  %1836 = vadd.xlane.f32.xlu0 %v4414_v41  ;;  %1838 = vadd.xlane.f32.xlu1 %v4411_v43 }
 0x22d   : > { %v1605_v24 = vpop.f32.mrb[23].mxu1  ;;  %v4419_v60 = vadd.f32 %v3244_v50, %v4304_v16 }
 0x22e   : > { %v4422_v1 = vadd.f32 %v1605_v24, %v4304_v16 }
 0x230   : > { %v3247_v42 = vpop.f32.mrb[24].mxu1  ;;  %1840 = vadd.xlane.f32.xlu0 %v4422_v1  ;;  %1842 = vadd.xlane.f32.xlu1 %v4419_v60 }
 0x231   : > { %v1615_v13 = vpop.f32.mrb[25].mxu1  ;;  %v4427_v46 = vadd.f32 %v3247_v42, %v4304_v16 }
 0x232   : > { %v4430_v31 = vadd.f32 %v1615_v13, %v4304_v16 }
 0x234   : > { %v3250_v34 = vpop.f32.mrb[26].mxu1  ;;  %1844 = vadd.xlane.f32.xlu0 %v4430_v31  ;;  %1846 = vadd.xlane.f32.xlu1 %v4427_v46 }
 0x235   : > { %v1625_v52 = vpop.f32.mrb[27].mxu1  ;;  %v4435_v48 = vadd.f32 %v3250_v34, %v4304_v16 }
 0x236   : > { %v4438_v55 = vadd.f32 %v1625_v52, %v4304_v16 }
 0x238   : > { %v3253_v33 = vpop.f32.mrb[28].mxu1  ;;  %1848 = vadd.xlane.f32.xlu0 %v4438_v55  ;;  %1850 = vadd.xlane.f32.xlu1 %v4435_v48 }
 0x239   : > { %v1635_v57 = vpop.f32.mrb[29].mxu1  ;;  %v4443_v59 = vadd.f32 %v3253_v33, %v4304_v16 }
 0x23a   : > { %v4446_v0 = vadd.f32 %v1635_v57, %v4304_v16 }
 0x23c   : > { %v3256_v37 = vpop.f32.mrb[30].mxu1  ;;  %1852 = vadd.xlane.f32.xlu0 %v4446_v0  ;;  %1854 = vadd.xlane.f32.xlu1 %v4443_v59 }
 0x23d   : > { %v1645_v62 = vpop.f32.mrb[31].mxu1  ;;  %v4451_v47 = vadd.f32 %v3256_v37, %v4304_v16 }
 0x23e   : > { %v4454_v8 = vadd.f32 %v1645_v62, %v4304_v16 }
 0x240   : > { %v3259_v11 = vpop.f32.mrb[32].mxu1  ;;  %1856 = vadd.xlane.f32.xlu0 %v4454_v8  ;;  %1858 = vadd.xlane.f32.xlu1 %v4451_v47 }
 0x241   : > { %v1655_v12 = vpop.f32.mrb[33].mxu1  ;;  %v4459_v5 = vadd.f32 %v3259_v11, %v4304_v16 }
 0x242   : > { %v4462_v17 = vadd.f32 %v1655_v12, %v4304_v16 }
 0x244   : > { %v3262_v18 = vpop.f32.mrb[34].mxu1  ;;  %1860 = vadd.xlane.f32.xlu0 %v4462_v17  ;;  %1862 = vadd.xlane.f32.xlu1 %v4459_v5 }
 0x245   : > { %v1665_v14 = vpop.f32.mrb[35].mxu1  ;;  %v4467_v21 = vadd.f32 %v3262_v18, %v4304_v16 }
 0x246   : > { %v4470_v2 = vadd.f32 %v1665_v14, %v4304_v16 }
 0x248   : > { %v3265_v30 = vpop.f32.mrb[36].mxu1  ;;  %1864 = vadd.xlane.f32.xlu0 %v4470_v2  ;;  %1866 = vadd.xlane.f32.xlu1 %v4467_v21 }
 0x249   : > { %v1675_v38 = vpop.f32.mrb[37].mxu1  ;;  %v4475_v20 = vadd.f32 %v3265_v30, %v4304_v16 }
 0x24a   : > { %v4478_v19 = vadd.f32 %v1675_v38, %v4304_v16 }
 0x24c   : > { %v3268_v44 = vpop.f32.mrb[38].mxu1  ;;  %1868 = vadd.xlane.f32.xlu0 %v4478_v19  ;;  %1870 = vadd.xlane.f32.xlu1 %v4475_v20 }
 0x24d   : > { %v1685_v25 = vpop.f32.mrb[39].mxu1  ;;  %v4483_v50 = vadd.f32 %v3268_v44, %v4304_v16 }
 0x24e   : > { %v4486_v24 = vadd.f32 %v1685_v25, %v4304_v16 }
 0x250   : > { %v3271_v42 = vpop.f32.mrb[40].mxu1  ;;  %1872 = vadd.xlane.f32.xlu0 %v4486_v24  ;;  %1874 = vadd.xlane.f32.xlu1 %v4483_v50 }
 0x251   : > { %v1695_v13 = vpop.f32.mrb[41].mxu1  ;;  %v4491_v34 = vadd.f32 %v3271_v42, %v4304_v16 }
 0x252   : > { %v4494_v52 = vadd.f32 %v1695_v13, %v4304_v16 }
 0x254   : > { %v3274_v33 = vpop.f32.mrb[42].mxu1  ;;  %1876 = vadd.xlane.f32.xlu0 %v4494_v52  ;;  %1878 = vadd.xlane.f32.xlu1 %v4491_v34 }
 0x255   : > { %v1705_v57 = vpop.f32.mrb[43].mxu1  ;;  %v4499_v37 = vadd.f32 %v3274_v33, %v4304_v16 }
 0x256   : > { %v4502_v62 = vadd.f32 %v1705_v57, %v4304_v16 }
 0x258   : > { %v3277_v11 = vpop.f32.mrb[44].mxu1  ;;  %1880 = vadd.xlane.f32.xlu0 %v4502_v62  ;;  %1882 = vadd.xlane.f32.xlu1 %v4499_v37 }
 0x259   : > { %v1715_v12 = vpop.f32.mrb[45].mxu1  ;;  %v4507_v18 = vadd.f32 %v3277_v11, %v4304_v16 }
 0x25a   : > { %v4510_v14 = vadd.f32 %v1715_v12, %v4304_v16 }
 0x25c   : > { %v3280_v30 = vpop.f32.mrb[46].mxu1  ;;  %1884 = vadd.xlane.f32.xlu0 %v4510_v14  ;;  %1886 = vadd.xlane.f32.xlu1 %v4507_v18 }
 0x25d   : > { %v1725_v38 = vpop.f32.mrb[47].mxu1  ;;  %v4515_v44 = vadd.f32 %v3280_v30, %v4304_v16 }
 0x25e   : > { %v4518_v25 = vadd.f32 %v1725_v38, %v4304_v16 }
 0x25f   : > { %5195 = vst [vmem:[#allocation6_spill] sm:$0xff] %v4515_v44 }
 0x260   : > { %5196 = vst [vmem:[#allocation7_spill] sm:$0xff] %v4518_v25  ;;  %v3283_v42 = vpop.f32.mrb[48].mxu1  ;;  %1888 = vadd.xlane.f32.xlu0 %v4518_v25  ;;  %1890 = vadd.xlane.f32.xlu1 %v4515_v44 }
 0x261   : > { %v1735_v13 = vpop.f32.mrb[49].mxu1  ;;  %v4523_v33 = vadd.f32 %v3283_v42, %v4304_v16 }
 0x262   : > { %v4526_v57 = vadd.f32 %v1735_v13, %v4304_v16 }
 0x263   : > { %5197 = vst [vmem:[#allocation8_spill] sm:$0xff] %v4523_v33 }
 0x264   : > { %5198 = vst [vmem:[#allocation9_spill] sm:$0xff] %v4526_v57  ;;  %v3286_v11 = vpop.f32.mrb[50].mxu1  ;;  %1892 = vadd.xlane.f32.xlu0 %v4526_v57  ;;  %1894 = vadd.xlane.f32.xlu1 %v4523_v33 }
 0x265   : > { %v1745_v12 = vpop.f32.mrb[51].mxu1  ;;  %v4531_v30 = vadd.f32 %v3286_v11, %v4304_v16 }
 0x266   : > { %v4534_v38 = vadd.f32 %v1745_v12, %v4304_v16 }
 0x267   : > { %5199 = vst [vmem:[#allocation10_spill] sm:$0xff] %v4531_v30 }
 0x268   : > { %5200 = vst [vmem:[#allocation11_spill] sm:$0xff] %v4534_v38  ;;  %v3289_v26 = vpop.f32.mrb[52].mxu1  ;;  %1896 = vadd.xlane.f32.xlu0 %v4534_v38  ;;  %1898 = vadd.xlane.f32.xlu1 %v4531_v30 }
 0x269   : > { %v1755_v42 = vpop.f32.mrb[53].mxu1  ;;  %v4539_v13 = vadd.f32 %v3289_v26, %v4304_v16 }
 0x26a   : > { %v4542_v57 = vadd.f32 %v1755_v42, %v4304_v16 }
 0x26b   : > { %5201 = vst [vmem:[#allocation12_spill] sm:$0xff] %v4539_v13 }
 0x26c   : > { %5202 = vst [vmem:[#allocation13_spill] sm:$0xff] %v4542_v57  ;;  %v3292_v33 = vpop.f32.mrb[54].mxu1  ;;  %1900 = vadd.xlane.f32.xlu0 %v4542_v57  ;;  %1902 = vadd.xlane.f32.xlu1 %v4539_v13 }
 0x26d   : > { %v1765_v11 = vpop.f32.mrb[55].mxu1  ;;  %v4547_v12 = vadd.f32 %v3292_v33, %v4304_v16 }
 0x26e   : > { %v4550_v38 = vadd.f32 %v1765_v11, %v4304_v16 }
 0x26f   : > { %5203 = vst [vmem:[#allocation14_spill] sm:$0xff] %v4547_v12 }
 0x270   : > { %5204 = vst [vmem:[#allocation15_spill] sm:$0xff] %v4550_v38  ;;  %v3295_v30 = vpop.f32.mrb[56].mxu1  ;;  %1904 = vadd.xlane.f32.xlu0 %v4550_v38  ;;  %1906 = vadd.xlane.f32.xlu1 %v4547_v12 }
 0x271   : > { %v1775_v26 = vpop.f32.mrb[57].mxu1  ;;  %v4555_v42 = vadd.f32 %v3295_v30, %v4304_v16 }
 0x272   : > { %v4558_v57 = vadd.f32 %v1775_v26, %v4304_v16 }
 0x273   : > { %5205 = vst [vmem:[#allocation16_spill] sm:$0xff] %v4555_v42 }
 0x274   : > { %5206 = vst [vmem:[#allocation17_spill] sm:$0xff] %v4558_v57  ;;  %1908 = vadd.xlane.f32.xlu0 %v4558_v57  ;;  %1910 = vadd.xlane.f32.xlu1 %v4555_v42 }
 0x281   : > { %v1787_v33 = vpop.xlane.xlu0 %1786 }
 0x282   : > { %v1914_v13 = vmul.f32 0.0078125, %v1787_v33 }
 0x284   : > { %v4563_v11 = vsub.f32 %v4307_v40, %v1914_v13 }
 0x285   : > { %v1791_v44 = vpop.xlane.xlu1 %1790  ;;  %v1785_v38 = vpop.xlane.xlu0 %1784 }
 0x286   : > { %v1916_v25 = vmul.f32 0.0078125, %v1791_v44  ;;  %v1913_v12 = vmul.f32 0.0078125, %v1785_v38  ;;  %v2042_v30 = vmul.f32 %v4563_v11, %v4563_v11 }
 0x288   : > { %2107 = vadd.xlane.f32.xlu1 %v2042_v30  ;;  %v4568_v16 = vsub.f32 %v4314_v32, %v1916_v25  ;;  %v4571_v26 = vsub.f32 %v4311_v15, %v1913_v12 }
 0x289   : > { %v1789_v42 = vpop.xlane.xlu1 %1788 }
 0x28a   : > { %5207 = vst [vmem:[#allocation18_spill] sm:$0xff] %v4571_v26  ;;  %v1915_v57 = vmul.f32 0.0078125, %v1789_v42  ;;  %v1793_v33 = vpop.xlane.xlu0 %1792  ;;  %v2044_v40 = vmul.f32 %v4568_v16, %v4568_v16  ;;  %v2041_v44 = vmul.f32 %v4571_v26, %v4571_v26 }
 0x28b   : > { %v1917_v38 = vmul.f32 0.0078125, %v1793_v33 }
 0x28c   : > { %2111 = vadd.xlane.f32.xlu1 %v2044_v40  ;;  %2105 = vadd.xlane.f32.xlu0 %v2041_v44  ;;  %v4578_v13 = vsub.f32 %v4319_v54, %v1915_v57 }
 0x28d   : > { %v1795_v32 = vpop.xlane.xlu1 %1794  ;;  %v4583_v12 = vsub.f32 %v4322_v56, %v1917_v38 }
 0x28e   : > { %v1918_v25 = vmul.f32 0.0078125, %v1795_v32  ;;  %v2043_v15 = vmul.f32 %v4578_v13, %v4578_v13 }
 0x28f   : > { %v2045_v57 = vmul.f32 %v4583_v12, %v4583_v12 }
 0x290   : > { %v1797_v42 = vpop.xlane.xlu0 %1796  ;;  %2109 = vadd.xlane.f32.xlu0 %v2043_v15  ;;  %v4586_v30 = vsub.f32 %v4327_v53, %v1918_v25 }
 0x291   : > { %v1919_v26 = vmul.f32 0.0078125, %v1797_v42  ;;  %v1799_v33 = vpop.xlane.xlu1 %1798 }
 0x292   : > { %v1920_v40 = vmul.f32 0.0078125, %v1799_v33  ;;  %v2046_v54 = vmul.f32 %v4586_v30, %v4586_v30 }
 0x293   : > { %v4593_v44 = vsub.f32 %v4331_v58, %v1919_v26 }
 0x294   : > { %v1801_v32 = vpop.xlane.xlu0 %1800  ;;  %2115 = vadd.xlane.f32.xlu1 %v2046_v54  ;;  %2113 = vadd.xlane.f32.xlu0 %v2045_v57  ;;  %v4596_v56 = vsub.f32 %v4334_v45, %v1920_v40 }
 0x295   : > { %v1921_v53 = vmul.f32 0.0078125, %v1801_v32  ;;  %v1803_v38 = vpop.xlane.xlu1 %1802  ;;  %v2047_v42 = vmul.f32 %v4593_v44, %v4593_v44 }
 0x296   : > { %v1922_v25 = vmul.f32 0.0078125, %v1803_v38  ;;  %v2048_v15 = vmul.f32 %v4596_v56, %v4596_v56 }
 0x297   : > { %v4603_v33 = vsub.f32 %v4339_v35, %v1921_v53 }
 0x298   : > { %v1805_v58 = vpop.xlane.xlu0 %1804  ;;  %2119 = vadd.xlane.f32.xlu1 %v2048_v15  ;;  %2117 = vadd.xlane.f32.xlu0 %v2047_v42  ;;  %v4606_v26 = vsub.f32 %v4342_v29, %v1922_v25 }
 0x299   : > { %v1923_v45 = vmul.f32 0.0078125, %v1805_v58  ;;  %v1807_v40 = vpop.xlane.xlu1 %1806  ;;  %v2049_v32 = vmul.f32 %v4603_v33, %v4603_v33 }
 0x29a   : > { %v1924_v54 = vmul.f32 0.0078125, %v1807_v40  ;;  %v2050_v57 = vmul.f32 %v4606_v26, %v4606_v26 }
 0x29b   : > { %v4613_v38 = vsub.f32 %v4347_v7, %v1923_v45 }
 0x29c   : > { %v1809_v35 = vpop.xlane.xlu0 %1808  ;;  %2123 = vadd.xlane.f32.xlu1 %v2050_v57  ;;  %2121 = vadd.xlane.f32.xlu0 %v2049_v32  ;;  %v4616_v53 = vsub.f32 %v4350_v4, %v1924_v54 }
 0x29d   : > { %v1925_v29 = vmul.f32 0.0078125, %v1809_v35  ;;  %v1811_v25 = vpop.xlane.xlu1 %1810  ;;  %v2051_v58 = vmul.f32 %v4613_v38, %v4613_v38 }
 0x29e   : > { %v1926_v15 = vmul.f32 0.0078125, %v1811_v25  ;;  %v2052_v42 = vmul.f32 %v4616_v53, %v4616_v53 }
 0x29f   : > { %v4623_v40 = vsub.f32 %v4355_v61, %v1925_v29 }
 0x2a0   : > { %v1813_v7 = vpop.xlane.xlu0 %1812  ;;  %2127 = vadd.xlane.f32.xlu1 %v2052_v42  ;;  %2125 = vadd.xlane.f32.xlu0 %v2051_v58  ;;  %v4626_v45 = vsub.f32 %v4358_v10, %v1926_v15 }
 0x2a1   : > { %v1927_v4 = vmul.f32 0.0078125, %v1813_v7  ;;  %v1815_v54 = vpop.xlane.xlu1 %1814  ;;  %v2053_v35 = vmul.f32 %v4623_v40, %v4623_v40 }
 0x2a2   : > { %v1928_v57 = vmul.f32 0.0078125, %v1815_v54  ;;  %v2054_v32 = vmul.f32 %v4626_v45, %v4626_v45 }
 0x2a3   : > { %v4633_v25 = vsub.f32 %v4363_v27, %v1927_v4 }
 0x2a4   : > { %v1817_v61 = vpop.xlane.xlu0 %1816  ;;  %2131 = vadd.xlane.f32.xlu1 %v2054_v32  ;;  %2129 = vadd.xlane.f32.xlu0 %v2053_v35  ;;  %v4636_v29 = vsub.f32 %v4366_v36, %v1928_v57 }
 0x2a5   : > { %v1929_v10 = vmul.f32 0.0078125, %v1817_v61  ;;  %v1819_v15 = vpop.xlane.xlu1 %1818  ;;  %v2055_v7 = vmul.f32 %v4633_v25, %v4633_v25 }
 0x2a6   : > { %v1930_v42 = vmul.f32 0.0078125, %v1819_v15  ;;  %v2056_v58 = vmul.f32 %v4636_v29, %v4636_v29 }
 0x2a7   : > { %v4643_v54 = vsub.f32 %v4371_v3, %v1929_v10 }
 0x2a8   : > { %2135 = vadd.xlane.f32.xlu1 %v2056_v58  ;;  %2133 = vadd.xlane.f32.xlu0 %v2055_v7  ;;  %v4646_v27 = vsub.f32 %v4374_v39, %v1930_v42 }
 0x2a9   : > { %v1821_v4 = vpop.xlane.xlu0 %1820  ;;  %v1823_v36 = vpop.xlane.xlu1 %1822  ;;  %v2057_v61 = vmul.f32 %v4643_v54, %v4643_v54 }
 0x2aa   : > { %v1931_v57 = vmul.f32 0.0078125, %v1821_v4  ;;  %v1932_v32 = vmul.f32 0.0078125, %v1823_v36  ;;  %v2058_v35 = vmul.f32 %v4646_v27, %v4646_v27 }
 0x2ac   : > { %2139 = vadd.xlane.f32.xlu1 %v2058_v35  ;;  %2137 = vadd.xlane.f32.xlu0 %v2057_v61  ;;  %v4653_v3 = vsub.f32 %v4379_v63, %v1932_v32  ;;  %v4656_v10 = vsub.f32 %v4382_v9, %v1931_v57 }
 0x2ad   : > { %v1825_v39 = vpop.xlane.xlu0 %1824  ;;  %v1827_v15 = vpop.xlane.xlu1 %1826 }
 0x2ae   : > { %v1933_v42 = vmul.f32 0.0078125, %v1825_v39  ;;  %v1934_v58 = vmul.f32 0.0078125, %v1827_v15  ;;  %v2060_v7 = vmul.f32 %v4653_v3, %v4653_v3  ;;  %v2059_v4 = vmul.f32 %v4656_v10, %v4656_v10 }
 0x2b0   : > { %2143 = vadd.xlane.f32.xlu1 %v2060_v7  ;;  %2141 = vadd.xlane.f32.xlu0 %v2059_v4  ;;  %v4663_v36 = vsub.f32 %v4387_v23, %v1934_v58  ;;  %v4666_v63 = vsub.f32 %v4390_v28, %v1933_v42 }
 0x2b1   : > { %v1829_v9 = vpop.xlane.xlu0 %1828  ;;  %v1831_v57 = vpop.xlane.xlu1 %1830 }
 0x2b2   : > { %v1935_v32 = vmul.f32 0.0078125, %v1829_v9  ;;  %v1936_v35 = vmul.f32 0.0078125, %v1831_v57  ;;  %v2062_v61 = vmul.f32 %v4663_v36, %v4663_v36  ;;  %v2061_v39 = vmul.f32 %v4666_v63, %v4666_v63 }
 0x2b4   : > { %2147 = vadd.xlane.f32.xlu1 %v2062_v61  ;;  %2145 = vadd.xlane.f32.xlu0 %v2061_v39  ;;  %v4673_v15 = vsub.f32 %v4395_v22, %v1936_v35  ;;  %v4676_v23 = vsub.f32 %v4398_v6, %v1935_v32 }
 0x2b5   : > { %v1833_v28 = vpop.xlane.xlu0 %1832  ;;  %v1835_v42 = vpop.xlane.xlu1 %1834 }
 0x2b6   : > { %v1937_v58 = vmul.f32 0.0078125, %v1833_v28  ;;  %v1938_v7 = vmul.f32 0.0078125, %v1835_v42  ;;  %v2064_v4 = vmul.f32 %v4673_v15, %v4673_v15  ;;  %v2063_v9 = vmul.f32 %v4676_v23, %v4676_v23 }
 0x2b8   : > { %2151 = vadd.xlane.f32.xlu1 %v2064_v4  ;;  %2149 = vadd.xlane.f32.xlu0 %v2063_v9  ;;  %v4683_v57 = vsub.f32 %v4403_v49, %v1938_v7  ;;  %v4686_v22 = vsub.f32 %v4406_v51, %v1937_v58 }
 0x2b9   : > { %v1837_v6 = vpop.xlane.xlu0 %1836  ;;  %v1839_v32 = vpop.xlane.xlu1 %1838 }
 0x2ba   : > { %v1939_v35 = vmul.f32 0.0078125, %v1837_v6  ;;  %v1940_v61 = vmul.f32 0.0078125, %v1839_v32  ;;  %v2066_v39 = vmul.f32 %v4683_v57, %v4683_v57  ;;  %v2065_v28 = vmul.f32 %v4686_v22, %v4686_v22 }
 0x2bc   : > { %2155 = vadd.xlane.f32.xlu1 %v2066_v39  ;;  %2153 = vadd.xlane.f32.xlu0 %v2065_v28  ;;  %v4693_v42 = vsub.f32 %v4411_v43, %v1940_v61  ;;  %v4696_v49 = vsub.f32 %v4414_v41, %v1939_v35 }
 0x2bd   : > { %v1841_v51 = vpop.xlane.xlu0 %1840  ;;  %v1843_v58 = vpop.xlane.xlu1 %1842 }
 0x2be   : > { %v1941_v7 = vmul.f32 0.0078125, %v1841_v51  ;;  %v1942_v4 = vmul.f32 0.0078125, %v1843_v58  ;;  %v2068_v9 = vmul.f32 %v4693_v42, %v4693_v42  ;;  %v2067_v6 = vmul.f32 %v4696_v49, %v4696_v49 }
 0x2c0   : > { %2159 = vadd.xlane.f32.xlu1 %v2068_v9  ;;  %2157 = vadd.xlane.f32.xlu0 %v2067_v6  ;;  %v4703_v32 = vsub.f32 %v4419_v60, %v1942_v4  ;;  %v4706_v43 = vsub.f32 %v4422_v1, %v1941_v7 }
 0x2c1   : > { %v1845_v41 = vpop.xlane.xlu0 %1844  ;;  %v1847_v35 = vpop.xlane.xlu1 %1846 }
 0x2c2   : > { %v1943_v61 = vmul.f32 0.0078125, %v1845_v41  ;;  %v1944_v39 = vmul.f32 0.0078125, %v1847_v35  ;;  %v2070_v28 = vmul.f32 %v4703_v32, %v4703_v32  ;;  %v2069_v51 = vmul.f32 %v4706_v43, %v4706_v43 }
 0x2c4   : > { %v4713_v58 = vsub.f32 %v4430_v31, %v1943_v61  ;;  %v4716_v9 = vsub.f32 %v4427_v46, %v1944_v39  ;;  %2163 = vadd.xlane.f32.xlu1 %v2070_v28  ;;  %2161 = vadd.xlane.f32.xlu0 %v2069_v51 }
 0x2c5   : > { %v1849_v60 = vpop.xlane.xlu0 %1848  ;;  %v1851_v1 = vpop.xlane.xlu1 %1850 }
 0x2c6   : > { %v1945_v7 = vmul.f32 0.0078125, %v1849_v60  ;;  %v1946_v4 = vmul.f32 0.0078125, %v1851_v1  ;;  %v2072_v6 = vmul.f32 %v4716_v9, %v4716_v9  ;;  %v2071_v41 = vmul.f32 %v4713_v58, %v4713_v58 }
 0x2c8   : > { %v4723_v35 = vsub.f32 %v4438_v55, %v1945_v7  ;;  %v4726_v31 = vsub.f32 %v4435_v48, %v1946_v4  ;;  %2167 = vadd.xlane.f32.xlu1 %v2072_v6  ;;  %2165 = vadd.xlane.f32.xlu0 %v2071_v41 }
 0x2c9   : > { %v1853_v46 = vpop.xlane.xlu0 %1852  ;;  %v1855_v61 = vpop.xlane.xlu1 %1854 }
 0x2ca   : > { %v1947_v39 = vmul.f32 0.0078125, %v1853_v46  ;;  %v1948_v28 = vmul.f32 0.0078125, %v1855_v61  ;;  %v2074_v51 = vmul.f32 %v4726_v31, %v4726_v31  ;;  %v2073_v60 = vmul.f32 %v4723_v35, %v4723_v35 }
 0x2cc   : > { %v4733_v1 = vsub.f32 %v4446_v0, %v1947_v39  ;;  %v4736_v55 = vsub.f32 %v4443_v59, %v1948_v28  ;;  %2171 = vadd.xlane.f32.xlu1 %v2074_v51  ;;  %2169 = vadd.xlane.f32.xlu0 %v2073_v60 }
 0x2cd   : > { %v1857_v48 = vpop.xlane.xlu0 %1856  ;;  %v1859_v7 = vpop.xlane.xlu1 %1858 }
 0x2ce   : > { %v1949_v4 = vmul.f32 0.0078125, %v1857_v48  ;;  %v1950_v6 = vmul.f32 0.0078125, %v1859_v7  ;;  %v2076_v41 = vmul.f32 %v4736_v55, %v4736_v55  ;;  %v2075_v46 = vmul.f32 %v4733_v1, %v4733_v1 }
 0x2d0   : > { %v4743_v61 = vsub.f32 %v4454_v8, %v1949_v4  ;;  %v4746_v0 = vsub.f32 %v4451_v47, %v1950_v6  ;;  %2175 = vadd.xlane.f32.xlu1 %v2076_v41  ;;  %2173 = vadd.xlane.f32.xlu0 %v2075_v46 }
 0x2d1   : > { %v1861_v59 = vpop.xlane.xlu0 %1860  ;;  %v1863_v39 = vpop.xlane.xlu1 %1862 }
 0x2d2   : > { %v1951_v28 = vmul.f32 0.0078125, %v1861_v59  ;;  %v1952_v51 = vmul.f32 0.0078125, %v1863_v39  ;;  %v2078_v60 = vmul.f32 %v4746_v0, %v4746_v0  ;;  %v2077_v48 = vmul.f32 %v4743_v61, %v4743_v61 }
 0x2d4   : > { %v4753_v7 = vsub.f32 %v4462_v17, %v1951_v28  ;;  %v4756_v8 = vsub.f32 %v4459_v5, %v1952_v51  ;;  %2179 = vadd.xlane.f32.xlu1 %v2078_v60  ;;  %2177 = vadd.xlane.f32.xlu0 %v2077_v48 }
 0x2d5   : > { %v1865_v47 = vpop.xlane.xlu0 %1864  ;;  %v1867_v4 = vpop.xlane.xlu1 %1866 }
 0x2d6   : > { %v1953_v6 = vmul.f32 0.0078125, %v1865_v47  ;;  %v1954_v41 = vmul.f32 0.0078125, %v1867_v4  ;;  %v2080_v46 = vmul.f32 %v4756_v8, %v4756_v8  ;;  %v2079_v59 = vmul.f32 %v4753_v7, %v4753_v7 }
 0x2d8   : > { %v4763_v39 = vsub.f32 %v4470_v2, %v1953_v6  ;;  %v4766_v17 = vsub.f32 %v4467_v21, %v1954_v41  ;;  %2183 = vadd.xlane.f32.xlu1 %v2080_v46  ;;  %2181 = vadd.xlane.f32.xlu0 %v2079_v59 }
 0x2d9   : > { %v1869_v5 = vpop.xlane.xlu0 %1868  ;;  %v1871_v28 = vpop.xlane.xlu1 %1870 }
 0x2da   : > { %v1955_v51 = vmul.f32 0.0078125, %v1869_v5  ;;  %v1956_v60 = vmul.f32 0.0078125, %v1871_v28  ;;  %v2082_v48 = vmul.f32 %v4766_v17, %v4766_v17  ;;  %v2081_v47 = vmul.f32 %v4763_v39, %v4763_v39 }
 0x2dc   : > { %v4773_v4 = vsub.f32 %v4478_v19, %v1955_v51  ;;  %v4776_v2 = vsub.f32 %v4475_v20, %v1956_v60  ;;  %2187 = vadd.xlane.f32.xlu1 %v2082_v48  ;;  %2185 = vadd.xlane.f32.xlu0 %v2081_v47 }
 0x2dd   : > { %v1873_v21 = vpop.xlane.xlu0 %1872  ;;  %v1875_v6 = vpop.xlane.xlu1 %1874 }
 0x2de   : > { %v1957_v41 = vmul.f32 0.0078125, %v1873_v21  ;;  %v1958_v46 = vmul.f32 0.0078125, %v1875_v6  ;;  %v2084_v59 = vmul.f32 %v4776_v2, %v4776_v2  ;;  %v2083_v5 = vmul.f32 %v4773_v4, %v4773_v4 }
 0x2e0   : > { %v4783_v28 = vsub.f32 %v4486_v24, %v1957_v41  ;;  %v4786_v19 = vsub.f32 %v4483_v50, %v1958_v46  ;;  %2191 = vadd.xlane.f32.xlu1 %v2084_v59  ;;  %2189 = vadd.xlane.f32.xlu0 %v2083_v5 }
 0x2e1   : > { %v1877_v20 = vpop.xlane.xlu0 %1876  ;;  %v1879_v51 = vpop.xlane.xlu1 %1878 }
 0x2e2   : > { %v1959_v60 = vmul.f32 0.0078125, %v1877_v20  ;;  %v1960_v48 = vmul.f32 0.0078125, %v1879_v51  ;;  %v2086_v47 = vmul.f32 %v4786_v19, %v4786_v19  ;;  %v2085_v21 = vmul.f32 %v4783_v28, %v4783_v28 }
 0x2e4   : > { %v4793_v6 = vsub.f32 %v4494_v52, %v1959_v60  ;;  %v4796_v24 = vsub.f32 %v4491_v34, %v1960_v48  ;;  %2195 = vadd.xlane.f32.xlu1 %v2086_v47  ;;  %2193 = vadd.xlane.f32.xlu0 %v2085_v21 }
 0x2e5   : > { %v1881_v50 = vpop.xlane.xlu0 %1880  ;;  %v1883_v41 = vpop.xlane.xlu1 %1882 }
 0x2e6   : > { %5208 = vst [vmem:[#allocation19_spill] sm:$0xff] %v4793_v6  ;;  %5209 = vst [vmem:[#allocation20_spill] sm:$0xff] %v4796_v24  ;;  %v1961_v46 = vmul.f32 0.0078125, %v1881_v50  ;;  %v1962_v59 = vmul.f32 0.0078125, %v1883_v41  ;;  %v2088_v5 = vmul.f32 %v4796_v24, %v4796_v24  ;;  %v2087_v20 = vmul.f32 %v4793_v6, %v4793_v6 }
 0x2e8   : > { %v4803_v51 = vsub.f32 %v4502_v62, %v1961_v46  ;;  %v4806_v52 = vsub.f32 %v4499_v37, %v1962_v59  ;;  %2199 = vadd.xlane.f32.xlu1 %v2088_v5  ;;  %2197 = vadd.xlane.f32.xlu0 %v2087_v20 }
 0x2e9   : > { %v1885_v34 = vpop.xlane.xlu0 %1884  ;;  %v1887_v60 = vpop.xlane.xlu1 %1886 }
 0x2ea   : > { %5210 = vst [vmem:[#allocation21_spill] sm:$0xff] %v4803_v51  ;;  %5211 = vst [vmem:[#allocation22_spill] sm:$0xff] %v4806_v52  ;;  %v1963_v48 = vmul.f32 0.0078125, %v1885_v34  ;;  %v1964_v47 = vmul.f32 0.0078125, %v1887_v60  ;;  %v2090_v21 = vmul.f32 %v4806_v52, %v4806_v52  ;;  %v2089_v50 = vmul.f32 %v4803_v51, %v4803_v51  ;;  %v5214_v60 = vld [vmem:[#allocation7_spill] sm:$0xff] }
 0x2ec   : > { %v4813_v41 = vsub.f32 %v4510_v14, %v1963_v48  ;;  %v4816_v62 = vsub.f32 %v4507_v18, %v1964_v47  ;;  %2203 = vadd.xlane.f32.xlu1 %v2090_v21  ;;  %2201 = vadd.xlane.f32.xlu0 %v2089_v50  ;;  %v5216_v14 = vld [vmem:[#allocation6_spill] sm:$0xff] }
 0x2ed   : > { %v1889_v37 = vpop.xlane.xlu0 %1888  ;;  %v1891_v46 = vpop.xlane.xlu1 %1890 }
 0x2ee   : > { %5212 = vst [vmem:[#allocation23_spill] sm:$0xff] %v4813_v41  ;;  %5213 = vst [vmem:[#allocation24_spill] sm:$0xff] %v4816_v62  ;;  %v1965_v59 = vmul.f32 0.0078125, %v1889_v37  ;;  %v1966_v5 = vmul.f32 0.0078125, %v1891_v46  ;;  %v2092_v20 = vmul.f32 %v4816_v62, %v4816_v62  ;;  %v2091_v34 = vmul.f32 %v4813_v41, %v4813_v41  ;;  %v5218_v62 = vld [vmem:[#allocation9_spill] sm:$0xff] }
 0x2f0   : > { %v4823_v51 = vsub.f32 %v5214_v60, %v1965_v59  ;;  %v4826_v48 = vsub.f32 %v5216_v14, %v1966_v5  ;;  %2207 = vadd.xlane.f32.xlu1 %v2092_v20  ;;  %2205 = vadd.xlane.f32.xlu0 %v2091_v34  ;;  %v5220_v59 = vld [vmem:[#allocation8_spill] sm:$0xff] }
 0x2f1   : > { %v1893_v18 = vpop.xlane.xlu0 %1892  ;;  %v1895_v47 = vpop.xlane.xlu1 %1894 }
 0x2f2   : > { %5215 = vst [vmem:[#allocation7_spill] sm:$0xff] %v4823_v51  ;;  %5217 = vst [vmem:[#allocation6_spill] sm:$0xff] %v4826_v48  ;;  %v1967_v21 = vmul.f32 0.0078125, %v1893_v18  ;;  %v1968_v50 = vmul.f32 0.0078125, %v1895_v47  ;;  %v2094_v37 = vmul.f32 %v4826_v48, %v4826_v48  ;;  %v2093_v46 = vmul.f32 %v4823_v51, %v4823_v51  ;;  %v5222_v48 = vld [vmem:[#allocation11_spill] sm:$0xff] }
 0x2f4   : > { %v4833_v41 = vsub.f32 %v5218_v62, %v1967_v21  ;;  %v4836_v60 = vsub.f32 %v5220_v59, %v1968_v50  ;;  %2211 = vadd.xlane.f32.xlu1 %v2094_v37  ;;  %2209 = vadd.xlane.f32.xlu0 %v2093_v46  ;;  %v5224_v62 = vld [vmem:[#allocation10_spill] sm:$0xff] }
 0x2f5   : > { %v1897_v5 = vpop.xlane.xlu0 %1896  ;;  %v1899_v20 = vpop.xlane.xlu1 %1898 }
 0x2f6   : > { %5219 = vst [vmem:[#allocation9_spill] sm:$0xff] %v4833_v41  ;;  %5221 = vst [vmem:[#allocation8_spill] sm:$0xff] %v4836_v60  ;;  %v1969_v34 = vmul.f32 0.0078125, %v1897_v5  ;;  %v1970_v14 = vmul.f32 0.0078125, %v1899_v20  ;;  %v2096_v18 = vmul.f32 %v4836_v60, %v4836_v60  ;;  %v2095_v47 = vmul.f32 %v4833_v41, %v4833_v41  ;;  %v5226_v60 = vld [vmem:[#allocation13_spill] sm:$0xff] }
 0x2f8   : > { %v4843_v51 = vsub.f32 %v5222_v48, %v1969_v34  ;;  %v4846_v21 = vsub.f32 %v5224_v62, %v1970_v14  ;;  %2215 = vadd.xlane.f32.xlu1 %v2096_v18  ;;  %2213 = vadd.xlane.f32.xlu0 %v2095_v47  ;;  %v5228_v48 = vld [vmem:[#allocation12_spill] sm:$0xff] }
 0x2f9   : > { %v1901_v50 = vpop.xlane.xlu0 %1900  ;;  %v1903_v37 = vpop.xlane.xlu1 %1902 }
 0x2fa   : > { %5223 = vst [vmem:[#allocation11_spill] sm:$0xff] %v4843_v51  ;;  %5225 = vst [vmem:[#allocation10_spill] sm:$0xff] %v4846_v21  ;;  %v1971_v46 = vmul.f32 0.0078125, %v1901_v50  ;;  %v1972_v59 = vmul.f32 0.0078125, %v1903_v37  ;;  %v2098_v5 = vmul.f32 %v4846_v21, %v4846_v21  ;;  %v2097_v20 = vmul.f32 %v4843_v51, %v4843_v51  ;;  %v5230_v21 = vld [vmem:[#allocation15_spill] sm:$0xff] }
 0x2fc   : > { %v4853_v41 = vsub.f32 %v5226_v60, %v1971_v46  ;;  %v4856_v34 = vsub.f32 %v5228_v48, %v1972_v59  ;;  %2219 = vadd.xlane.f32.xlu1 %v2098_v5  ;;  %2217 = vadd.xlane.f32.xlu0 %v2097_v20  ;;  %v5232_v60 = vld [vmem:[#allocation14_spill] sm:$0xff] }
 0x2fd   : > { %v1905_v14 = vpop.xlane.xlu0 %1904  ;;  %v1907_v18 = vpop.xlane.xlu1 %1906 }
 0x2fe   : > { %5227 = vst [vmem:[#allocation13_spill] sm:$0xff] %v4853_v41  ;;  %5229 = vst [vmem:[#allocation12_spill] sm:$0xff] %v4856_v34  ;;  %v1973_v47 = vmul.f32 0.0078125, %v1905_v14  ;;  %v1974_v62 = vmul.f32 0.0078125, %v1907_v18  ;;  %v2100_v50 = vmul.f32 %v4856_v34, %v4856_v34  ;;  %v2099_v37 = vmul.f32 %v4853_v41, %v4853_v41  ;;  %v5234_v34 = vld [vmem:[#allocation17_spill] sm:$0xff] }
 0x300   : > { %v4863_v51 = vsub.f32 %v5230_v21, %v1973_v47  ;;  %v4866_v46 = vsub.f32 %v5232_v60, %v1974_v62  ;;  %2223 = vadd.xlane.f32.xlu1 %v2100_v50  ;;  %2221 = vadd.xlane.f32.xlu0 %v2099_v37  ;;  %v5236_v21 = vld [vmem:[#allocation16_spill] sm:$0xff] }
 0x301   : > { %v1909_v59 = vpop.xlane.xlu0 %1908  ;;  %v1911_v5 = vpop.xlane.xlu1 %1910 }
 0x302   : > { %5231 = vst [vmem:[#allocation15_spill] sm:$0xff] %v4863_v51  ;;  %5233 = vst [vmem:[#allocation14_spill] sm:$0xff] %v4866_v46  ;;  %v1975_v20 = vmul.f32 0.0078125, %v1909_v59  ;;  %v1976_v48 = vmul.f32 0.0078125, %v1911_v5  ;;  %v2102_v14 = vmul.f32 %v4866_v46, %v4866_v46  ;;  %v2101_v18 = vmul.f32 %v4863_v51, %v4863_v51 }
 0x304   : > { %v4873_v41 = vsub.f32 %v5234_v34, %v1975_v20  ;;  %v4876_v47 = vsub.f32 %v5236_v21, %v1976_v48  ;;  %2227 = vadd.xlane.f32.xlu1 %v2102_v14  ;;  %2225 = vadd.xlane.f32.xlu0 %v2101_v18 }
 0x306   : > { %5235 = vst [vmem:[#allocation17_spill] sm:$0xff] %v4873_v41  ;;  %5237 = vst [vmem:[#allocation16_spill] sm:$0xff] %v4876_v47  ;;  %v2104_v62 = vmul.f32 %v4876_v47, %v4876_v47  ;;  %v2103_v50 = vmul.f32 %v4873_v41, %v4873_v41  ;;  %v5238_v47 = vld [vmem:[#allocation5_spill] sm:$0xff] }
 0x307   : > { %v2491_v46 = vsub.s32 2, %v5238_v47 }
 0x308   : > { %2231 = vadd.xlane.f32.xlu1 %v2104_v62  ;;  %2229 = vadd.xlane.f32.xlu0 %v2103_v50  ;;  %v2559_v62 = vsub.s32 3, %v5238_v47 }
 0x315   : > { %v2108_v37 = vpop.xlane.xlu1 %2107 }
 0x316   : > { %v2234_v60 = vmul.f32 0.0078125, %v2108_v37 }
 0x318   : > { %v2298_v59 = vadd.f32 1e-05, %v2234_v60 }
 0x319   : > { %v2112_v5 = vpop.xlane.xlu1 %2111  ;;  %v2106_v51 = vpop.xlane.xlu0 %2105 }
 0x31a   : > { %3609 = vrsqrt.f32 %v2298_v59  ;;  %v2236_v34 = vmul.f32 0.0078125, %v2112_v5  ;;  %v2233_v20 = vmul.f32 0.0078125, %v2106_v51  ;;  %v3738_v59 = vld [vmem:[%s3976_s18] sm:$0xf] }
 0x31b   : > { %v4885_v5 = vrot.slane %v3738_v59, %v2491_v46 }
 0x31c   : > { %v2300_v48 = vadd.f32 1e-05, %v2236_v34  ;;  %v2297_v14 = vadd.f32 1e-05, %v2233_v20 }
 0x31d   : > { %v2110_v18 = vpop.xlane.xlu0 %2109 }
 0x31e   : > { %3611 = vrsqrt.f32 %v2300_v48  ;;  %v2235_v21 = vmul.f32 0.0078125, %v2110_v18  ;;  %v4887_v48 = vrot.slane %v3738_v59, %v2559_v62 }
 0x31f   : > { %3613 = vrsqrt.f32 %v2297_v14 }
 0x320   : > { %v2299_v41 = vadd.f32 1e-05, %v2235_v21 }
 0x321   : > { %v2116_v50 = vpop.xlane.xlu1 %2115  ;;  %v2114_v37 = vpop.xlane.xlu0 %2113 }
 0x322   : > { %3615 = vrsqrt.f32 %v2299_v41  ;;  %v2238_v60 = vmul.f32 0.0078125, %v2116_v50  ;;  %v2237_v52 = vmul.f32 0.0078125, %v2114_v37 }
 0x324   : > { %v3610_v51 = vpop.eup %3609  ;;  %v2302_v34 = vadd.f32 1e-05, %v2238_v60  ;;  %v2301_v20 = vadd.f32 1e-05, %v2237_v52 }
 0x325   : > { %v2426_v18 = vmul.f32 %v3610_v51, %v4563_v11  ;;  %v2120_v14 = vpop.xlane.xlu1 %2119  ;;  %v2118_v21 = vpop.xlane.xlu0 %2117  ;;  %v5239_v51 = vld [vmem:[#allocation18_spill] sm:$0xff] }
 0x326   : > { %3617 = vrsqrt.f32 %v2302_v34  ;;  %v2240_v47 = vmul.f32 0.0078125, %v2120_v14  ;;  %v2239_v6 = vmul.f32 0.0078125, %v2118_v21 }
 0x327   : > { %v2494_v41 = vmul.f32 %v4885_v5, %v2426_v18  ;;  %3619 = vrsqrt.f32 %v2301_v20 }
 0x328   : > { %v3612_v50 = vpop.eup %3611  ;;  %v2304_v52 = vadd.f32 1e-05, %v2240_v47  ;;  %v2303_v46 = vadd.f32 1e-05, %v2239_v6 }
 0x329   : > { %v3614_v62 = vpop.eup %3613  ;;  %v2562_v11 = vadd.f32 %v4887_v48, %v2494_v41  ;;  %v2428_v37 = vmul.f32 %v3612_v50, %v4568_v16  ;;  %v2124_v60 = vpop.xlane.xlu1 %2123 }
 0x32a   : > { %v2122_v59 = vpop.xlane.xlu0 %2121  ;;  %v2425_v34 = vmul.f32 %v3614_v62, %v5239_v51  ;;  %3621 = vrsqrt.f32 %v2304_v52  ;;  %v2242_v20 = vmul.f32 0.0078125, %v2124_v60 }
 0x32b   : > { %v2241_v18 = vmul.f32 0.0078125, %v2122_v59  ;;  %2626 = vst [vmem:[%s4896_s21 + $0x8] sm:$0xff] %v2562_v11  ;;  %v2496_v14 = vmul.f32 %v4885_v5, %v2428_v37  ;;  %3623 = vrsqrt.f32 %v2303_v46 }
 0x32c   : > { %v3616_v21 = vpop.eup %3615  ;;  %v2493_v6 = vmul.f32 %v4885_v5, %v2425_v34  ;;  %v2306_v47 = vadd.f32 1e-05, %v2242_v20 }
 0x32d   : > { %v2305_v41 = vadd.f32 1e-05, %v2241_v18  ;;  %v2564_v16 = vadd.f32 %v4887_v48, %v2496_v14  ;;  %v2427_v50 = vmul.f32 %v3616_v21, %v4578_v13  ;;  %v2128_v24 = vpop.xlane.xlu1 %2127 }
 0x32e   : > { %v2126_v62 = vpop.xlane.xlu0 %2125  ;;  %v2561_v52 = vadd.f32 %v4887_v48, %v2493_v6  ;;  %3625 = vrsqrt.f32 %v2306_v47  ;;  %v2244_v60 = vmul.f32 0.0078125, %v2128_v24 }
 0x32f   : > { %v2243_v11 = vmul.f32 0.0078125, %v2126_v62  ;;  %2628 = vst [vmem:[%s4896_s21 + $0x18] sm:$0xff] %v2564_v16  ;;  %v2495_v46 = vmul.f32 %v4885_v5, %v2427_v50  ;;  %3627 = vrsqrt.f32 %v2305_v41 }
 0x330   : > { %v3618_v37 = vpop.eup %3617  ;;  %2625 = vst [vmem:[%s4896_s21] sm:$0xff] %v2561_v52  ;;  %v2308_v59 = vadd.f32 1e-05, %v2244_v60 }
 0x331   : > { %v2307_v51 = vadd.f32 1e-05, %v2243_v11  ;;  %v3620_v34 = vpop.eup %3619  ;;  %v2563_v20 = vadd.f32 %v4887_v48, %v2495_v46  ;;  %v2430_v13 = vmul.f32 %v3618_v37, %v4586_v30  ;;  %v2132_v18 = vpop.xlane.xlu1 %2131 }
 0x332   : > { %v2130_v14 = vpop.xlane.xlu0 %2129  ;;  %v2429_v21 = vmul.f32 %v3620_v34, %v4583_v12  ;;  %3629 = vrsqrt.f32 %v2308_v59  ;;  %v2246_v24 = vmul.f32 0.0078125, %v2132_v18 }
 0x333   : > { %v2245_v6 = vmul.f32 0.0078125, %v2130_v14  ;;  %2627 = vst [vmem:[%s4896_s21 + $0x10] sm:$0xff] %v2563_v20  ;;  %v2498_v47 = vmul.f32 %v4885_v5, %v2430_v13  ;;  %3631 = vrsqrt.f32 %v2307_v51 }
 0x334   : > { %v3622_v41 = vpop.eup %3621  ;;  %v2497_v16 = vmul.f32 %v4885_v5, %v2429_v21  ;;  %v2310_v50 = vadd.f32 1e-05, %v2246_v24 }
 0x335   : > { %v2309_v62 = vadd.f32 1e-05, %v2245_v6  ;;  %v3624_v52 = vpop.eup %3623  ;;  %v2566_v30 = vadd.f32 %v4887_v48, %v2498_v47  ;;  %v2432_v60 = vmul.f32 %v3622_v41, %v4596_v56  ;;  %v2136_v12 = vpop.xlane.xlu1 %2135 }
 0x336   : > { %v2134_v11 = vpop.xlane.xlu0 %2133  ;;  %v2565_v46 = vadd.f32 %v4887_v48, %v2497_v16  ;;  %v2431_v37 = vmul.f32 %v3624_v52, %v4593_v44  ;;  %3633 = vrsqrt.f32 %v2310_v50  ;;  %v2248_v59 = vmul.f32 0.0078125, %v2136_v12 }
 0x337   : > { %2630 = vst [vmem:[%s4896_s21 + $0x28] sm:$0xff] %v2566_v30  ;;  %v2500_v51 = vmul.f32 %v4885_v5, %v2432_v60  ;;  %3635 = vrsqrt.f32 %v2309_v62  ;;  %v2247_v34 = vmul.f32 0.0078125, %v2134_v11 }
 0x338   : > { %v3626_v20 = vpop.eup %3625  ;;  %2629 = vst [vmem:[%s4896_s21 + $0x20] sm:$0xff] %v2565_v46  ;;  %v2499_v13 = vmul.f32 %v4885_v5, %v2431_v37  ;;  %v2312_v18 = vadd.f32 1e-05, %v2248_v59 }
 0x339   : > { %v3628_v56 = vpop.eup %3627  ;;  %v2568_v14 = vadd.f32 %v4887_v48, %v2500_v51  ;;  %v2434_v21 = vmul.f32 %v3626_v20, %v4606_v26  ;;  %v2311_v44 = vadd.f32 1e-05, %v2247_v34  ;;  %v2140_v24 = vpop.xlane.xlu1 %2139 }
 0x33a   : > { %v2138_v6 = vpop.xlane.xlu0 %2137  ;;  %v2567_v47 = vadd.f32 %v4887_v48, %v2499_v13  ;;  %v2433_v41 = vmul.f32 %v3628_v56, %v4603_v33  ;;  %3637 = vrsqrt.f32 %v2312_v18  ;;  %v2250_v16 = vmul.f32 0.0078125, %v2140_v24 }
 0x33b   : > { %2632 = vst [vmem:[%s4896_s21 + $0x38] sm:$0xff] %v2568_v14  ;;  %v2502_v50 = vmul.f32 %v4885_v5, %v2434_v21  ;;  %3639 = vrsqrt.f32 %v2311_v44  ;;  %v2249_v62 = vmul.f32 0.0078125, %v2138_v6 }
 0x33c   : > { %v3630_v52 = vpop.eup %3629  ;;  %2631 = vst [vmem:[%s4896_s21 + $0x30] sm:$0xff] %v2567_v47  ;;  %v2501_v30 = vmul.f32 %v4885_v5, %v2433_v41  ;;  %v2314_v26 = vadd.f32 1e-05, %v2250_v16 }
 0x33d   : > { %v3632_v60 = vpop.eup %3631  ;;  %v2570_v12 = vadd.f32 %v4887_v48, %v2502_v50  ;;  %v2436_v11 = vmul.f32 %v3630_v52, %v4616_v53  ;;  %v2313_v33 = vadd.f32 1e-05, %v2249_v62  ;;  %v2144_v46 = vpop.xlane.xlu1 %2143 }
 0x33e   : > { %v2142_v37 = vpop.xlane.xlu0 %2141  ;;  %v2569_v59 = vadd.f32 %v4887_v48, %v2501_v30  ;;  %v2435_v51 = vmul.f32 %v3632_v60, %v4613_v38  ;;  %3641 = vrsqrt.f32 %v2314_v26  ;;  %v2252_v34 = vmul.f32 0.0078125, %v2144_v46 }
 0x33f   : > { %2634 = vst [vmem:[%s4896_s21 + $0x48] sm:$0xff] %v2570_v12  ;;  %v2504_v20 = vmul.f32 %v4885_v5, %v2436_v11  ;;  %3643 = vrsqrt.f32 %v2313_v33  ;;  %v2251_v13 = vmul.f32 0.0078125, %v2142_v37 }
 0x340   : > { %v3634_v18 = vpop.eup %3633  ;;  %2633 = vst [vmem:[%s4896_s21 + $0x40] sm:$0xff] %v2569_v59  ;;  %v2503_v56 = vmul.f32 %v4885_v5, %v2435_v51  ;;  %v2316_v53 = vadd.f32 1e-05, %v2252_v34 }
 0x341   : > { %v3636_v14 = vpop.eup %3635  ;;  %v2572_v21 = vadd.f32 %v4887_v48, %v2504_v20  ;;  %v2438_v44 = vmul.f32 %v3634_v18, %v4626_v45  ;;  %v2315_v38 = vadd.f32 1e-05, %v2251_v13  ;;  %v2148_v24 = vpop.xlane.xlu1 %2147 }
 0x342   : > { %v2146_v6 = vpop.xlane.xlu0 %2145  ;;  %v2571_v47 = vadd.f32 %v4887_v48, %v2503_v56  ;;  %v2437_v41 = vmul.f32 %v3636_v14, %v4623_v40  ;;  %3645 = vrsqrt.f32 %v2316_v53  ;;  %v2254_v16 = vmul.f32 0.0078125, %v2148_v24 }
 0x343   : > { %2636 = vst [vmem:[%s4896_s21 + $0x58] sm:$0xff] %v2572_v21  ;;  %v2506_v50 = vmul.f32 %v4885_v5, %v2438_v44  ;;  %3647 = vrsqrt.f32 %v2315_v38  ;;  %v2253_v62 = vmul.f32 0.0078125, %v2146_v6 }
 0x344   : > { %v3638_v52 = vpop.eup %3637  ;;  %2635 = vst [vmem:[%s4896_s21 + $0x50] sm:$0xff] %v2571_v47  ;;  %v2505_v30 = vmul.f32 %v4885_v5, %v2437_v41  ;;  %v2318_v45 = vadd.f32 1e-05, %v2254_v16 }
 0x345   : > { %v3640_v26 = vpop.eup %3639  ;;  %v2574_v60 = vadd.f32 %v4887_v48, %v2506_v50  ;;  %v2440_v12 = vmul.f32 %v3638_v52, %v4636_v29  ;;  %v2317_v40 = vadd.f32 1e-05, %v2253_v62  ;;  %v2152_v11 = vpop.xlane.xlu1 %2151 }
 0x346   : > { %v2150_v33 = vpop.xlane.xlu0 %2149  ;;  %v2573_v46 = vadd.f32 %v4887_v48, %v2505_v30  ;;  %v2439_v37 = vmul.f32 %v3640_v26, %v4633_v25  ;;  %3649 = vrsqrt.f32 %v2318_v45  ;;  %v2256_v59 = vmul.f32 0.0078125, %v2152_v11 }
 0x347   : > { %2638 = vst [vmem:[%s4896_s21 + $0x68] sm:$0xff] %v2574_v60  ;;  %v2508_v51 = vmul.f32 %v4885_v5, %v2440_v12  ;;  %3651 = vrsqrt.f32 %v2317_v40  ;;  %v2255_v34 = vmul.f32 0.0078125, %v2150_v33 }
 0x348   : > { %v3642_v20 = vpop.eup %3641  ;;  %2637 = vst [vmem:[%s4896_s21 + $0x60] sm:$0xff] %v2573_v46  ;;  %v2507_v13 = vmul.f32 %v4885_v5, %v2439_v37  ;;  %v2320_v29 = vadd.f32 1e-05, %v2256_v59 }
 0x349   : > { %v3644_v18 = vpop.eup %3643  ;;  %v2576_v56 = vadd.f32 %v4887_v48, %v2508_v51  ;;  %v2442_v53 = vmul.f32 %v3642_v20, %v4646_v27  ;;  %v2319_v25 = vadd.f32 1e-05, %v2255_v34  ;;  %v2156_v14 = vpop.xlane.xlu1 %2155 }
 0x34a   : > { %v2154_v21 = vpop.xlane.xlu0 %2153  ;;  %v2575_v44 = vadd.f32 %v4887_v48, %v2507_v13  ;;  %v2441_v38 = vmul.f32 %v3644_v18, %v4643_v54  ;;  %3653 = vrsqrt.f32 %v2320_v29  ;;  %v2258_v24 = vmul.f32 0.0078125, %v2156_v14 }
 0x34b   : > { %2640 = vst [vmem:[%s4896_s21 + $0x78] sm:$0xff] %v2576_v56  ;;  %v2510_v6 = vmul.f32 %v4885_v5, %v2442_v53  ;;  %3655 = vrsqrt.f32 %v2319_v25  ;;  %v2257_v47 = vmul.f32 0.0078125, %v2154_v21 }
 0x34c   : > { %v3646_v41 = vpop.eup %3645  ;;  %2639 = vst [vmem:[%s4896_s21 + $0x70] sm:$0xff] %v2575_v44  ;;  %v2509_v16 = vmul.f32 %v4885_v5, %v2441_v38  ;;  %v2322_v27 = vadd.f32 1e-05, %v2258_v24 }
 0x34d   : > { %v3648_v50 = vpop.eup %3647  ;;  %v2578_v62 = vadd.f32 %v4887_v48, %v2510_v6  ;;  %v2444_v52 = vmul.f32 %v3646_v41, %v4653_v3  ;;  %v2321_v54 = vadd.f32 1e-05, %v2257_v47  ;;  %v2160_v30 = vpop.xlane.xlu1 %2159 }
 0x34e   : > { %v2158_v45 = vpop.xlane.xlu0 %2157  ;;  %v2577_v26 = vadd.f32 %v4887_v48, %v2509_v16  ;;  %v2443_v60 = vmul.f32 %v3648_v50, %v4656_v10  ;;  %3657 = vrsqrt.f32 %v2322_v27  ;;  %v2260_v12 = vmul.f32 0.0078125, %v2160_v30 }
 0x34f   : > { %2642 = vst [vmem:[%s4896_s21 + $0x88] sm:$0xff] %v2578_v62  ;;  %v2512_v40 = vmul.f32 %v4885_v5, %v2444_v52  ;;  %3659 = vrsqrt.f32 %v2321_v54  ;;  %v2259_v11 = vmul.f32 0.0078125, %v2158_v45 }
 0x350   : > { %v3650_v33 = vpop.eup %3649  ;;  %2641 = vst [vmem:[%s4896_s21 + $0x80] sm:$0xff] %v2577_v26  ;;  %v2511_v46 = vmul.f32 %v4885_v5, %v2443_v60  ;;  %v2324_v3 = vadd.f32 1e-05, %v2260_v12 }
 0x351   : > { %v3652_v37 = vpop.eup %3651  ;;  %v2580_v59 = vadd.f32 %v4887_v48, %v2512_v40  ;;  %v2446_v51 = vmul.f32 %v3650_v33, %v4663_v36  ;;  %v2323_v10 = vadd.f32 1e-05, %v2259_v11  ;;  %v2164_v34 = vpop.xlane.xlu1 %2163 }
 0x352   : > { %v2162_v20 = vpop.xlane.xlu0 %2161  ;;  %v2579_v13 = vadd.f32 %v4887_v48, %v2511_v46  ;;  %v2445_v29 = vmul.f32 %v3652_v37, %v4666_v63  ;;  %3661 = vrsqrt.f32 %v2324_v3  ;;  %v2262_v18 = vmul.f32 0.0078125, %v2164_v34 }
 0x353   : > { %2644 = vst [vmem:[%s4896_s21 + $0x98] sm:$0xff] %v2580_v59  ;;  %v2514_v56 = vmul.f32 %v4885_v5, %v2446_v51  ;;  %3663 = vrsqrt.f32 %v2323_v10  ;;  %v2261_v53 = vmul.f32 0.0078125, %v2162_v20 }
 0x354   : > { %v3654_v25 = vpop.eup %3653  ;;  %2643 = vst [vmem:[%s4896_s21 + $0x90] sm:$0xff] %v2579_v13  ;;  %v2513_v14 = vmul.f32 %v4885_v5, %v2445_v29  ;;  %v2326_v36 = vadd.f32 1e-05, %v2262_v18 }
 0x355   : > { %v3656_v21 = vpop.eup %3655  ;;  %v2582_v44 = vadd.f32 %v4887_v48, %v2514_v56  ;;  %v2448_v38 = vmul.f32 %v3654_v25, %v4673_v15  ;;  %v2325_v63 = vadd.f32 1e-05, %v2261_v53  ;;  %v2168_v24 = vpop.xlane.xlu1 %2167 }
 0x356   : > { %v2166_v6 = vpop.xlane.xlu0 %2165  ;;  %v2581_v47 = vadd.f32 %v4887_v48, %v2513_v14  ;;  %v2447_v41 = vmul.f32 %v3656_v21, %v4676_v23  ;;  %3665 = vrsqrt.f32 %v2326_v36  ;;  %v2264_v16 = vmul.f32 0.0078125, %v2168_v24 }
 0x357   : > { %2646 = vst [vmem:[%s4896_s21 + $0xa8] sm:$0xff] %v2582_v44  ;;  %v2516_v27 = vmul.f32 %v4885_v5, %v2448_v38  ;;  %3667 = vrsqrt.f32 %v2325_v63  ;;  %v2263_v50 = vmul.f32 0.0078125, %v2166_v6 }
 0x358   : > { %v3658_v62 = vpop.eup %3657  ;;  %2645 = vst [vmem:[%s4896_s21 + $0xa0] sm:$0xff] %v2581_v47  ;;  %v2515_v52 = vmul.f32 %v4885_v5, %v2447_v41  ;;  %v2328_v15 = vadd.f32 1e-05, %v2264_v16 }
 0x359   : > { %v3660_v54 = vpop.eup %3659  ;;  %v2584_v30 = vadd.f32 %v4887_v48, %v2516_v27  ;;  %v2450_v45 = vmul.f32 %v3658_v62, %v4683_v57  ;;  %v2327_v23 = vadd.f32 1e-05, %v2263_v50  ;;  %v2172_v26 = vpop.xlane.xlu1 %2171 }
 0x35a   : > { %v2170_v60 = vpop.xlane.xlu0 %2169  ;;  %v2583_v12 = vadd.f32 %v4887_v48, %v2515_v52  ;;  %v2449_v40 = vmul.f32 %v3660_v54, %v4686_v22  ;;  %3669 = vrsqrt.f32 %v2328_v15  ;;  %v2266_v11 = vmul.f32 0.0078125, %v2172_v26 }
 0x35b   : > { %2648 = vst [vmem:[%s4896_s21 + $0xb8] sm:$0xff] %v2584_v30  ;;  %v2518_v33 = vmul.f32 %v4885_v5, %v2450_v45  ;;  %3671 = vrsqrt.f32 %v2327_v23  ;;  %v2265_v46 = vmul.f32 0.0078125, %v2170_v60 }
 0x35c   : > { %v3662_v3 = vpop.eup %3661  ;;  %2647 = vst [vmem:[%s4896_s21 + $0xb0] sm:$0xff] %v2583_v12  ;;  %v2517_v37 = vmul.f32 %v4885_v5, %v2449_v40  ;;  %v2330_v57 = vadd.f32 1e-05, %v2266_v11 }
 0x35d   : > { %v3664_v59 = vpop.eup %3663  ;;  %v2586_v51 = vadd.f32 %v4887_v48, %v2518_v33  ;;  %v2452_v10 = vmul.f32 %v3662_v3, %v4693_v42  ;;  %v2329_v22 = vadd.f32 1e-05, %v2265_v46  ;;  %v2176_v34 = vpop.xlane.xlu1 %2175 }
 0x35e   : > { %v2174_v20 = vpop.xlane.xlu0 %2173  ;;  %v2585_v13 = vadd.f32 %v4887_v48, %v2517_v37  ;;  %v2451_v29 = vmul.f32 %v3664_v59, %v4696_v49  ;;  %3673 = vrsqrt.f32 %v2330_v57  ;;  %v2268_v18 = vmul.f32 0.0078125, %v2176_v34 }
 0x35f   : > { %2650 = vst [vmem:[%s4896_s21 + $0xc8] sm:$0xff] %v2586_v51  ;;  %v2520_v56 = vmul.f32 %v4885_v5, %v2452_v10  ;;  %3675 = vrsqrt.f32 %v2329_v22  ;;  %v2267_v53 = vmul.f32 0.0078125, %v2174_v20 }
 0x360   : > { %v3666_v25 = vpop.eup %3665  ;;  %2649 = vst [vmem:[%s4896_s21 + $0xc0] sm:$0xff] %v2585_v13  ;;  %v2519_v14 = vmul.f32 %v4885_v5, %v2451_v29  ;;  %v2332_v42 = vadd.f32 1e-05, %v2268_v18 }
 0x361   : > { %v3668_v36 = vpop.eup %3667  ;;  %v2588_v21 = vadd.f32 %v4887_v48, %v2520_v56  ;;  %v2454_v44 = vmul.f32 %v3666_v25, %v4703_v32  ;;  %v2331_v49 = vadd.f32 1e-05, %v2267_v53  ;;  %v2180_v38 = vpop.xlane.xlu1 %2179 }
 0x362   : > { %v2178_v63 = vpop.xlane.xlu0 %2177  ;;  %v2587_v24 = vadd.f32 %v4887_v48, %v2519_v14  ;;  %v2453_v6 = vmul.f32 %v3668_v36, %v4706_v43  ;;  %3677 = vrsqrt.f32 %v2332_v42  ;;  %v2270_v47 = vmul.f32 0.0078125, %v2180_v38 }
 0x363   : > { %2652 = vst [vmem:[%s4896_s21 + $0xd8] sm:$0xff] %v2588_v21  ;;  %v2522_v41 = vmul.f32 %v4885_v5, %v2454_v44  ;;  %3679 = vrsqrt.f32 %v2331_v49  ;;  %v2269_v16 = vmul.f32 0.0078125, %v2178_v63 }
 0x364   : > { %v3670_v27 = vpop.eup %3669  ;;  %2651 = vst [vmem:[%s4896_s21 + $0xd0] sm:$0xff] %v2587_v24  ;;  %v2521_v50 = vmul.f32 %v4885_v5, %v2453_v6  ;;  %v2334_v32 = vadd.f32 1e-05, %v2270_v47 }
 0x365   : > { %v3672_v62 = vpop.eup %3671  ;;  %v2590_v52 = vadd.f32 %v4887_v48, %v2522_v41  ;;  %v2456_v15 = vmul.f32 %v3670_v27, %v4716_v9  ;;  %v2333_v43 = vadd.f32 1e-05, %v2269_v16  ;;  %v2184_v54 = vpop.xlane.xlu1 %2183 }
 0x366   : > { %v2182_v30 = vpop.xlane.xlu0 %2181  ;;  %v2589_v45 = vadd.f32 %v4887_v48, %v2521_v50  ;;  %v2455_v23 = vmul.f32 %v3672_v62, %v4713_v58  ;;  %3681 = vrsqrt.f32 %v2334_v32  ;;  %v2272_v26 = vmul.f32 0.0078125, %v2184_v54 }
 0x367   : > { %2654 = vst [vmem:[%s4896_s21 + $0xe8] sm:$0xff] %v2590_v52  ;;  %v2524_v60 = vmul.f32 %v4885_v5, %v2456_v15  ;;  %3683 = vrsqrt.f32 %v2333_v43  ;;  %v2271_v12 = vmul.f32 0.0078125, %v2182_v30 }
 0x368   : > { %v3674_v40 = vpop.eup %3673  ;;  %2653 = vst [vmem:[%s4896_s21 + $0xe0] sm:$0xff] %v2589_v45  ;;  %v2523_v11 = vmul.f32 %v4885_v5, %v2455_v23  ;;  %v2336_v9 = vadd.f32 1e-05, %v2272_v26 }
 0x369   : > { %v3676_v33 = vpop.eup %3675  ;;  %v2592_v46 = vadd.f32 %v4887_v48, %v2524_v60  ;;  %v2458_v3 = vmul.f32 %v3674_v40, %v4726_v31  ;;  %v2335_v58 = vadd.f32 1e-05, %v2271_v12  ;;  %v2188_v37 = vpop.xlane.xlu1 %2187 }
 0x36a   : > { %v2186_v57 = vpop.xlane.xlu0 %2185  ;;  %v2591_v59 = vadd.f32 %v4887_v48, %v2523_v11  ;;  %v2457_v51 = vmul.f32 %v3676_v33, %v4723_v35  ;;  %3685 = vrsqrt.f32 %v2336_v9  ;;  %v2274_v10 = vmul.f32 0.0078125, %v2188_v37 }
 0x36b   : > { %2656 = vst [vmem:[%s4896_s21 + $0xf8] sm:$0xff] %v2592_v46  ;;  %v2526_v22 = vmul.f32 %v4885_v5, %v2458_v3  ;;  %3687 = vrsqrt.f32 %v2335_v58  ;;  %v2273_v34 = vmul.f32 0.0078125, %v2186_v57 }
 0x36c   : > { %v3678_v20 = vpop.eup %3677  ;;  %2655 = vst [vmem:[%s4896_s21 + $0xf0] sm:$0xff] %v2591_v59  ;;  %v2525_v13 = vmul.f32 %v4885_v5, %v2457_v51  ;;  %v2338_v31 = vadd.f32 1e-05, %v2274_v10 }
 0x36d   : > { %v3680_v29 = vpop.eup %3679  ;;  %v2594_v18 = vadd.f32 %v4887_v48, %v2526_v22  ;;  %v2460_v56 = vmul.f32 %v3678_v20, %v4736_v55  ;;  %v2337_v35 = vadd.f32 1e-05, %v2273_v34  ;;  %v2192_v53 = vpop.xlane.xlu1 %2191 }
 0x36e   : > { %v2190_v25 = vpop.xlane.xlu0 %2189  ;;  %v2593_v14 = vadd.f32 %v4887_v48, %v2525_v13  ;;  %v2459_v42 = vmul.f32 %v3680_v29, %v4733_v1  ;;  %3689 = vrsqrt.f32 %v2338_v31  ;;  %v2276_v36 = vmul.f32 0.0078125, %v2192_v53 }
 0x36f   : > { %2658 = vst [vmem:[%s4896_s21 + $0x108] sm:$0xff] %v2594_v18  ;;  %v2528_v21 = vmul.f32 %v4885_v5, %v2460_v56  ;;  %3691 = vrsqrt.f32 %v2337_v35  ;;  %v2275_v44 = vmul.f32 0.0078125, %v2190_v25 }
 0x370   : > { %v3682_v49 = vpop.eup %3681  ;;  %2657 = vst [vmem:[%s4896_s21 + $0x100] sm:$0xff] %v2593_v14  ;;  %v2527_v38 = vmul.f32 %v4885_v5, %v2459_v42  ;;  %v2340_v55 = vadd.f32 1e-05, %v2276_v36 }
 0x371   : > { %v3684_v63 = vpop.eup %3683  ;;  %v2596_v24 = vadd.f32 %v4887_v48, %v2528_v21  ;;  %v2462_v6 = vmul.f32 %v3682_v49, %v4746_v0  ;;  %v2339_v1 = vadd.f32 1e-05, %v2275_v44  ;;  %v2196_v47 = vpop.xlane.xlu1 %2195 }
 0x372   : > { %v2194_v41 = vpop.xlane.xlu0 %2193  ;;  %v2595_v16 = vadd.f32 %v4887_v48, %v2527_v38  ;;  %v2461_v27 = vmul.f32 %v3684_v63, %v4743_v61  ;;  %3693 = vrsqrt.f32 %v2340_v55  ;;  %v2278_v50 = vmul.f32 0.0078125, %v2196_v47 }
 0x373   : > { %2660 = vst [vmem:[%s4896_s21 + $0x118] sm:$0xff] %v2596_v24  ;;  %v2530_v32 = vmul.f32 %v4885_v5, %v2462_v6  ;;  %3695 = vrsqrt.f32 %v2339_v1  ;;  %v2277_v62 = vmul.f32 0.0078125, %v2194_v41 }
 0x374   : > { %v3686_v52 = vpop.eup %3685  ;;  %2659 = vst [vmem:[%s4896_s21 + $0x110] sm:$0xff] %v2595_v16  ;;  %v2529_v15 = vmul.f32 %v4885_v5, %v2461_v27  ;;  %v2342_v0 = vadd.f32 1e-05, %v2278_v50 }
 0x375   : > { %v3688_v43 = vpop.eup %3687  ;;  %v2598_v54 = vadd.f32 %v4887_v48, %v2530_v32  ;;  %v2464_v30 = vmul.f32 %v3686_v52, %v4756_v8  ;;  %v2341_v61 = vadd.f32 1e-05, %v2277_v62  ;;  %v2200_v45 = vpop.xlane.xlu1 %2199  ;;  %v5240_v52 = vld [vmem:[#allocation20_spill] sm:$0xff] }
 0x376   : > { %v2198_v23 = vpop.xlane.xlu0 %2197  ;;  %v2597_v26 = vadd.f32 %v4887_v48, %v2529_v15  ;;  %v2463_v60 = vmul.f32 %v3688_v43, %v4753_v7  ;;  %3697 = vrsqrt.f32 %v2342_v0  ;;  %v2280_v12 = vmul.f32 0.0078125, %v2200_v45 }
 0x377   : > { %2662 = vst [vmem:[%s4896_s21 + $0x128] sm:$0xff] %v2598_v54  ;;  %v2532_v40 = vmul.f32 %v4885_v5, %v2464_v30  ;;  %3699 = vrsqrt.f32 %v2341_v61  ;;  %v2279_v11 = vmul.f32 0.0078125, %v2198_v23  ;;  %v5241_v30 = vld [vmem:[#allocation19_spill] sm:$0xff] }
 0x378   : > { %v3690_v9 = vpop.eup %3689  ;;  %2661 = vst [vmem:[%s4896_s21 + $0x120] sm:$0xff] %v2597_v26  ;;  %v2531_v33 = vmul.f32 %v4885_v5, %v2463_v60  ;;  %v2344_v8 = vadd.f32 1e-05, %v2280_v12 }
 0x379   : > { %v3692_v46 = vpop.eup %3691  ;;  %v2600_v3 = vadd.f32 %v4887_v48, %v2532_v40  ;;  %v2466_v58 = vmul.f32 %v3690_v9, %v4766_v17  ;;  %v2343_v7 = vadd.f32 1e-05, %v2279_v11  ;;  %v2204_v37 = vpop.xlane.xlu1 %2203 }
 0x37a   : > { %v2202_v57 = vpop.xlane.xlu0 %2201  ;;  %v2599_v59 = vadd.f32 %v4887_v48, %v2531_v33  ;;  %v2465_v51 = vmul.f32 %v3692_v46, %v4763_v39  ;;  %3701 = vrsqrt.f32 %v2344_v8  ;;  %v2282_v10 = vmul.f32 0.0078125, %v2204_v37  ;;  %v5242_v33 = vld [vmem:[#allocation22_spill] sm:$0xff]  ;;  %v5243_v37 = vld [vmem:[#allocation21_spill] sm:$0xff] }
 0x37b   : > { %2664 = vst [vmem:[%s4896_s21 + $0x138] sm:$0xff] %v2600_v3  ;;  %v2534_v22 = vmul.f32 %v4885_v5, %v2466_v58  ;;  %3703 = vrsqrt.f32 %v2343_v7  ;;  %v2281_v34 = vmul.f32 0.0078125, %v2202_v57 }
 0x37c   : > { %v3694_v20 = vpop.eup %3693  ;;  %2663 = vst [vmem:[%s4896_s21 + $0x130] sm:$0xff] %v2599_v59  ;;  %v2533_v13 = vmul.f32 %v4885_v5, %v2465_v51  ;;  %v2346_v17 = vadd.f32 1e-05, %v2282_v10 }
 0x37d   : > { %v3696_v31 = vpop.eup %3695  ;;  %v2602_v29 = vadd.f32 %v4887_v48, %v2534_v22  ;;  %v2468_v18 = vmul.f32 %v3694_v20, %v4776_v2  ;;  %v2345_v39 = vadd.f32 1e-05, %v2281_v34  ;;  %v2208_v56 = vpop.xlane.xlu1 %2207 }
 0x37e   : > { %v2206_v35 = vpop.xlane.xlu0 %2205  ;;  %v2601_v53 = vadd.f32 %v4887_v48, %v2533_v13  ;;  %v2467_v25 = vmul.f32 %v3696_v31, %v4773_v4  ;;  %3705 = vrsqrt.f32 %v2346_v17  ;;  %v2284_v14 = vmul.f32 0.0078125, %v2208_v56  ;;  %v5244_v31 = vld [vmem:[#allocation24_spill] sm:$0xff] }
 0x37f   : > { %2666 = vst [vmem:[%s4896_s21 + $0x148] sm:$0xff] %v2602_v29  ;;  %v2536_v42 = vmul.f32 %v4885_v5, %v2468_v18  ;;  %3707 = vrsqrt.f32 %v2345_v39  ;;  %v2283_v36 = vmul.f32 0.0078125, %v2206_v35 }
 0x380   : > { %v3698_v21 = vpop.eup %3697  ;;  %2665 = vst [vmem:[%s4896_s21 + $0x140] sm:$0xff] %v2601_v53  ;;  %v2535_v44 = vmul.f32 %v4885_v5, %v2467_v25  ;;  %v2348_v2 = vadd.f32 1e-05, %v2284_v14  ;;  %v5245_v53 = vld [vmem:[#allocation23_spill] sm:$0xff] }
 0x381   : > { %v3700_v49 = vpop.eup %3699  ;;  %v2604_v38 = vadd.f32 %v4887_v48, %v2536_v42  ;;  %v2470_v55 = vmul.f32 %v3698_v21, %v4786_v19  ;;  %v2347_v4 = vadd.f32 1e-05, %v2283_v36  ;;  %v2212_v63 = vpop.xlane.xlu1 %2211 }
 0x382   : > { %v2210_v24 = vpop.xlane.xlu0 %2209  ;;  %v2603_v6 = vadd.f32 %v4887_v48, %v2535_v44  ;;  %v2469_v1 = vmul.f32 %v3700_v49, %v4783_v28  ;;  %3709 = vrsqrt.f32 %v2348_v2  ;;  %v2286_v47 = vmul.f32 0.0078125, %v2212_v63 }
 0x383   : > { %2668 = vst [vmem:[%s4896_s21 + $0x158] sm:$0xff] %v2604_v38  ;;  %v2538_v41 = vmul.f32 %v4885_v5, %v2470_v55  ;;  %3711 = vrsqrt.f32 %v2347_v4  ;;  %v2285_v16 = vmul.f32 0.0078125, %v2210_v24  ;;  %v5246_v55 = vld [vmem:[#allocation6_spill] sm:$0xff] }
 0x384   : > { %v3702_v27 = vpop.eup %3701  ;;  %2667 = vst [vmem:[%s4896_s21 + $0x150] sm:$0xff] %v2603_v6  ;;  %v2537_v50 = vmul.f32 %v4885_v5, %v2469_v1  ;;  %v2350_v19 = vadd.f32 1e-05, %v2286_v47  ;;  %v5247_v47 = vld [vmem:[#allocation7_spill] sm:$0xff] }
 0x385   : > { %v3704_v32 = vpop.eup %3703  ;;  %v2606_v62 = vadd.f32 %v4887_v48, %v2538_v41  ;;  %v2472_v15 = vmul.f32 %v3702_v27, %v5240_v52  ;;  %v2349_v28 = vadd.f32 1e-05, %v2285_v16  ;;  %v2216_v0 = vpop.xlane.xlu1 %2215 }
 0x386   : > { %v2214_v43 = vpop.xlane.xlu0 %2213  ;;  %v2605_v54 = vadd.f32 %v4887_v48, %v2537_v50  ;;  %v2471_v61 = vmul.f32 %v3704_v32, %v5241_v30  ;;  %3713 = vrsqrt.f32 %v2350_v19  ;;  %v2288_v45 = vmul.f32 0.0078125, %v2216_v0 }
 0x387   : > { %2670 = vst [vmem:[%s4896_s21 + $0x168] sm:$0xff] %v2606_v62  ;;  %v2540_v23 = vmul.f32 %v4885_v5, %v2472_v15  ;;  %3715 = vrsqrt.f32 %v2349_v28  ;;  %v2287_v26 = vmul.f32 0.0078125, %v2214_v43  ;;  %v5248_v28 = vld [vmem:[#allocation8_spill] sm:$0xff] }
 0x388   : > { %v3706_v60 = vpop.eup %3705  ;;  %2669 = vst [vmem:[%s4896_s21 + $0x160] sm:$0xff] %v2605_v54  ;;  %v2539_v12 = vmul.f32 %v4885_v5, %v2471_v61  ;;  %v2352_v40 = vadd.f32 1e-05, %v2288_v45  ;;  %v5249_v45 = vld [vmem:[#allocation9_spill] sm:$0xff] }
 0x389   : > { %v3708_v11 = vpop.eup %3707  ;;  %v2608_v9 = vadd.f32 %v4887_v48, %v2540_v23  ;;  %v2474_v8 = vmul.f32 %v3706_v60, %v5242_v33  ;;  %v2351_v46 = vadd.f32 1e-05, %v2287_v26  ;;  %v2220_v3 = vpop.xlane.xlu1 %2219 }
 0x38a   : > { %v2218_v58 = vpop.xlane.xlu0 %2217  ;;  %v2607_v7 = vadd.f32 %v4887_v48, %v2539_v12  ;;  %v2473_v57 = vmul.f32 %v3708_v11, %v5243_v37  ;;  %3717 = vrsqrt.f32 %v2352_v40  ;;  %v2290_v59 = vmul.f32 0.0078125, %v2220_v3  ;;  %v5251_v37 = vld [vmem:[#allocation11_spill] sm:$0xff] }
 0x38b   : > { %2672 = vst [vmem:[%s4896_s21 + $0x178] sm:$0xff] %v2608_v9  ;;  %v2542_v51 = vmul.f32 %v4885_v5, %v2474_v8  ;;  %3719 = vrsqrt.f32 %v2351_v46  ;;  %v2289_v10 = vmul.f32 0.0078125, %v2218_v58  ;;  %v5250_v46 = vld [vmem:[#allocation10_spill] sm:$0xff] }
 0x38c   : > { %v3710_v22 = vpop.eup %3709  ;;  %2671 = vst [vmem:[%s4896_s21 + $0x170] sm:$0xff] %v2607_v7  ;;  %v2541_v34 = vmul.f32 %v4885_v5, %v2473_v57  ;;  %v2354_v20 = vadd.f32 1e-05, %v2290_v59 }
 0x38d   : > { %v3712_v13 = vpop.eup %3711  ;;  %v2610_v17 = vadd.f32 %v4887_v48, %v2542_v51  ;;  %v2476_v29 = vmul.f32 %v3710_v22, %v5244_v31  ;;  %v2353_v18 = vadd.f32 1e-05, %v2289_v10  ;;  %v2224_v39 = vpop.xlane.xlu1 %2223  ;;  %v5253_v31 = vld [vmem:[#allocation13_spill] sm:$0xff] }
 0x38e   : > { %v2222_v56 = vpop.xlane.xlu0 %2221  ;;  %v2609_v35 = vadd.f32 %v4887_v48, %v2541_v34  ;;  %v2475_v25 = vmul.f32 %v3712_v13, %v5245_v53  ;;  %3721 = vrsqrt.f32 %v2354_v20  ;;  %v2292_v14 = vmul.f32 0.0078125, %v2224_v39  ;;  %v5252_v20 = vld [vmem:[#allocation12_spill] sm:$0xff] }
 0x38f   : > { %2674 = vst [vmem:[%s4896_s21 + $0x188] sm:$0xff] %v2610_v17  ;;  %v2544_v42 = vmul.f32 %v4885_v5, %v2476_v29  ;;  %3723 = vrsqrt.f32 %v2353_v18  ;;  %v2291_v36 = vmul.f32 0.0078125, %v2222_v56 }
 0x390   : > { %v3714_v21 = vpop.eup %3713  ;;  %2673 = vst [vmem:[%s4896_s21 + $0x180] sm:$0xff] %v2609_v35  ;;  %v2543_v44 = vmul.f32 %v4885_v5, %v2475_v25  ;;  %v2356_v2 = vadd.f32 1e-05, %v2292_v14  ;;  %v5254_v25 = vld [vmem:[#allocation14_spill] sm:$0xff] }
 0x391   : > { %v3716_v49 = vpop.eup %3715  ;;  %v2612_v38 = vadd.f32 %v4887_v48, %v2544_v42  ;;  %v2478_v4 = vmul.f32 %v3714_v21, %v5246_v55  ;;  %v2355_v63 = vadd.f32 1e-05, %v2291_v36  ;;  %v2228_v24 = vpop.xlane.xlu1 %2227  ;;  %v5255_v36 = vld [vmem:[#allocation15_spill] sm:$0xff] }
 0x392   : > { %v2226_v6 = vpop.xlane.xlu0 %2225  ;;  %v2611_v1 = vadd.f32 %v4887_v48, %v2543_v44  ;;  %v2477_v41 = vmul.f32 %v3716_v49, %v5247_v47  ;;  %3725 = vrsqrt.f32 %v2356_v2  ;;  %v2294_v16 = vmul.f32 0.0078125, %v2228_v24 }
 0x393   : > { %2676 = vst [vmem:[%s4896_s21 + $0x198] sm:$0xff] %v2612_v38  ;;  %v2546_v27 = vmul.f32 %v4885_v5, %v2478_v4  ;;  %3727 = vrsqrt.f32 %v2355_v63  ;;  %v2293_v50 = vmul.f32 0.0078125, %v2226_v6  ;;  %v5256_v4 = vld [vmem:[#allocation16_spill] sm:$0xff]  ;;  %v5257_v6 = vld [vmem:[#allocation17_spill] sm:$0xff] }
 0x394   : > { %v3718_v19 = vpop.eup %3717  ;;  %2675 = vst [vmem:[%s4896_s21 + $0x190] sm:$0xff] %v2611_v1  ;;  %v2545_v32 = vmul.f32 %v4885_v5, %v2477_v41  ;;  %v2358_v62 = vadd.f32 1e-05, %v2294_v16 }
 0x395   : > { %v3720_v52 = vpop.eup %3719  ;;  %v2614_v15 = vadd.f32 %v4887_v48, %v2546_v27  ;;  %v2480_v0 = vmul.f32 %v3718_v19, %v5248_v28  ;;  %v2357_v43 = vadd.f32 1e-05, %v2293_v50  ;;  %v2232_v54 = vpop.xlane.xlu1 %2231 }
 0x396   : > { %v2230_v30 = vpop.xlane.xlu0 %2229  ;;  %v2613_v61 = vadd.f32 %v4887_v48, %v2545_v32  ;;  %v2479_v23 = vmul.f32 %v3720_v52, %v5249_v45  ;;  %3729 = vrsqrt.f32 %v2358_v62  ;;  %v2296_v26 = vmul.f32 0.0078125, %v2232_v54 }
 0x397   : > { %2678 = vst [vmem:[%s4896_s21 + $0x1a8] sm:$0xff] %v2614_v15  ;;  %v2548_v60 = vmul.f32 %v4885_v5, %v2480_v0  ;;  %3731 = vrsqrt.f32 %v2357_v43  ;;  %v2295_v12 = vmul.f32 0.0078125, %v2230_v30 }
 0x398   : > { %v3722_v40 = vpop.eup %3721  ;;  %2677 = vst [vmem:[%s4896_s21 + $0x1a0] sm:$0xff] %v2613_v61  ;;  %v2547_v11 = vmul.f32 %v4885_v5, %v2479_v23  ;;  %v2360_v9 = vadd.f32 1e-05, %v2296_v26 }
 0x399   : > { %v3724_v33 = vpop.eup %3723  ;;  %v2616_v8 = vadd.f32 %v4887_v48, %v2548_v60  ;;  %v2482_v3 = vmul.f32 %v3722_v40, %v5250_v46  ;;  %v2359_v58 = vadd.f32 1e-05, %v2295_v12 }
 0x39a   : > { %v2615_v7 = vadd.f32 %v4887_v48, %v2547_v11  ;;  %v2481_v57 = vmul.f32 %v3724_v33, %v5251_v37  ;;  %3733 = vrsqrt.f32 %v2360_v9 }
 0x39b   : > { %2680 = vst [vmem:[%s4896_s21 + $0x1b8] sm:$0xff] %v2616_v8  ;;  %v2550_v59 = vmul.f32 %v4885_v5, %v2482_v3  ;;  %3735 = vrsqrt.f32 %v2359_v58 }
 0x39c   : > { %v3726_v51 = vpop.eup %3725  ;;  %2679 = vst [vmem:[%s4896_s21 + $0x1b0] sm:$0xff] %v2615_v7  ;;  %v2549_v10 = vmul.f32 %v4885_v5, %v2481_v57 }
 0x39d   : > { %v3728_v22 = vpop.eup %3727  ;;  %v2618_v34 = vadd.f32 %v4887_v48, %v2550_v59  ;;  %v2484_v13 = vmul.f32 %v3726_v51, %v5252_v20 }
 0x39e   : > { %v2617_v17 = vadd.f32 %v4887_v48, %v2549_v10  ;;  %v2483_v29 = vmul.f32 %v3728_v22, %v5253_v31 }
 0x39f   : > { %2682 = vst [vmem:[%s4896_s21 + $0x1c8] sm:$0xff] %v2618_v34  ;;  %v2552_v18 = vmul.f32 %v4885_v5, %v2484_v13 }
 0x3a0   : > { %v3730_v39 = vpop.eup %3729  ;;  %2681 = vst [vmem:[%s4896_s21 + $0x1c0] sm:$0xff] %v2617_v17  ;;  %v2551_v56 = vmul.f32 %v4885_v5, %v2483_v29 }
 0x3a1   : > { %v3732_v35 = vpop.eup %3731  ;;  %v2620_v53 = vadd.f32 %v4887_v48, %v2552_v18  ;;  %v2486_v14 = vmul.f32 %v3730_v39, %v5254_v25 }
 0x3a2   : > { %v2619_v42 = vadd.f32 %v4887_v48, %v2551_v56  ;;  %v2485_v21 = vmul.f32 %v3732_v35, %v5255_v36 }
 0x3a3   : > { %2684 = vst [vmem:[%s4896_s21 + $0x1d8] sm:$0xff] %v2620_v53  ;;  %v2554_v44 = vmul.f32 %v4885_v5, %v2486_v14 }
 0x3a4   : > { %v3734_v2 = vpop.eup %3733  ;;  %2683 = vst [vmem:[%s4896_s21 + $0x1d0] sm:$0xff] %v2619_v42  ;;  %v2553_v49 = vmul.f32 %v4885_v5, %v2485_v21 }
 0x3a5   : > { %v3736_v38 = vpop.eup %3735  ;;  %v2622_v55 = vadd.f32 %v4887_v48, %v2554_v44  ;;  %v2488_v63 = vmul.f32 %v3734_v2, %v5256_v4 }
 0x3a6   : > { %v2621_v24 = vadd.f32 %v4887_v48, %v2553_v49  ;;  %v2487_v1 = vmul.f32 %v3736_v38, %v5257_v6 }
 0x3a7   : > { %2686 = vst [vmem:[%s4896_s21 + $0x1e8] sm:$0xff] %v2622_v55  ;;  %v2556_v47 = vmul.f32 %v4885_v5, %v2488_v63 }
 0x3a8   : > { %2685 = vst [vmem:[%s4896_s21 + $0x1e0] sm:$0xff] %v2621_v24  ;;  %v2555_v41 = vmul.f32 %v4885_v5, %v2487_v1 }
 0x3a9   : > { %v2624_v16 = vadd.f32 %v4887_v48, %v2556_v47 }
 0x3aa   : > { %v2623_v27 = vadd.f32 %v4887_v48, %v2555_v41 }
 0x3ab   : > { %2688 = vst [vmem:[%s4896_s21 + $0x1f8] sm:$0xff] %v2624_v16 }
 0x3ac   : > { %2687 = vst [vmem:[%s4896_s21 + $0x1f0] sm:$0xff] %v2623_v27 }
 0x3ad PF: > { %s21_s23 = sadd.s32 1, %s3759_s23  }
 0x3ae   : > { %p18_p12 = scmp.ge.s32.totalorder %s21_s23, 7  }
 0x3b0   :  { %20 = sbr.rel (!%p18_p12) target bundleno = 16 (0x10), region = 75 }

</bundles_post_ra>
